<compile_context>
chip_gen: v5e
topology: v5e:2x2
jax: 0.10.0
libtpu: 0.0.40
codegen_flags: <defaults>
</compile_context>

<pallas_src>
import functools

import jax
import jax.numpy as jnp
from jax.experimental import pallas as pl
from jax.experimental.pallas import tpu as pltpu

LANE = 128


def _round_up(n, m=LANE):
    return ((n + m - 1) // m) * m


def _pick_tile_h(H, tile_h):
    """Largest divisor of H that is <= tile_h (bounded VMEM for any H)."""
    th = max(1, min(tile_h, H))
    while H % th != 0:
        th -= 1
    return th


# ------------------------------- fused kernel ------------------------------- #

def _bottleneck_kernel(x_ref, xt_ref, xb_ref,
                       w1_ref, w2_ref, w3_ref,
                       b1_ref, b2_ref, b3_ref,
                       o_ref):
    TH, W, Cinp = x_ref.shape
    Cp = w1_ref.shape[1]
    Coutp = w3_ref.shape[1]
    cdt = w1_ref.dtype                      # matmul input dtype (f32 or bf16)

    h_idx = pl.program_id(1)
    n_h = pl.num_programs(1)

    def conv1_bn_relu(xm):                  # xm: (rows, Cinp) f32
        y = jnp.dot(xm.astype(cdt), w1_ref[...],
                    preferred_element_type=jnp.float32)
        return jnp.maximum(y + b1_ref[...], 0.0)

    # --- conv1 (1x1) + bn1 + relu on tile rows + the two halo rows (recompute) ---
    x_main = x_ref[...].reshape(TH * W, Cinp)
    out1_main = conv1_bn_relu(x_main).reshape(TH, W, Cp)
    out1_top = conv1_bn_relu(xt_ref[...].reshape(W, Cinp))
    out1_bot = conv1_bn_relu(xb_ref[...].reshape(W, Cinp))
    # conv2 zero-pads out1 at the image border: mask the halo on boundary tiles.
    out1_top = out1_top * (h_idx > 0).astype(jnp.float32)
    out1_bot = out1_bot * (h_idx < n_h - 1).astype(jnp.float32)

    out1_h = jnp.concatenate([out1_top[None], out1_main, out1_bot[None]], axis=0)
    zcol = jnp.zeros((TH + 2, 1, Cp), jnp.float32)
    out1_p = jnp.concatenate([zcol, out1_h, zcol], axis=1)       # (TH+2, W+2, Cp)

    # --- conv2 (3x3) + bn2 + relu: 9 shifted slabs -> ONE matmul, K = 9*Cp ---
    slabs = [out1_p[dy:dy + TH, dx:dx + W, :]
             for dy in range(3) for dx in range(3)]
    patches = jnp.concatenate(slabs, axis=-1).reshape(TH * W, 9 * Cp)
    y2 = jnp.dot(patches.astype(cdt), w2_ref[...],
                 preferred_element_type=jnp.float32)
    out2 = jnp.maximum(y2 + b2_ref[...], 0.0)                    # (TH*W, Cp)

    # --- conv3 (1x1) + bn3 + residual add + relu ---
    y3 = jnp.dot(out2.astype(cdt), w3_ref[...],
                 preferred_element_type=jnp.float32)
    y3 = y3 + b3_ref[...] + x_main                               # Cinp == Coutp
    o_ref[...] = jnp.maximum(y3, 0.0).reshape(TH, W, Coutp).astype(o_ref.dtype)


# ------------------------------ parameter glue ------------------------------ #

def _fold_bn(gamma, beta, mean, var, eps=1e-5):
    scale = gamma / jnp.sqrt(var + eps)
    bias = beta - mean * scale
    return scale, bias


def _pad_bias(bias, padded_c):
    pad = padded_c - bias.shape[0]
    return jnp.pad(bias, (0, pad)).reshape(1, padded_c).astype(jnp.float32)


def init_params(key, inplanes, planes):
    expansion = 4
    ks = jax.random.split(key, 12)
    p = {}
    # Conv weights in PyTorch OIHW layout.
    p["conv1_w"] = 0.1 * jax.random.normal(ks[0], (planes, inplanes, 1, 1), jnp.float32)
    p["conv2_w"] = 0.1 * jax.random.normal(ks[1], (planes, planes, 3, 3), jnp.float32)
    p["conv3_w"] = 0.1 * jax.random.normal(ks[2], (planes * expansion, planes, 1, 1), jnp.float32)
    for i, c in zip((1, 2, 3), (planes, planes, planes * expansion)):
        p[f"bn{i}_gamma"] = 1.0 + 0.1 * jax.random.normal(ks[2 + 3 * i - 2], (c,), jnp.float32)
        p[f"bn{i}_beta"] = 0.1 * jax.random.normal(ks[2 + 3 * i - 1], (c,), jnp.float32)
        p[f"bn{i}_mean"] = 0.1 * jax.random.normal(ks[2 + 3 * i], (c,), jnp.float32)
        p[f"bn{i}_var"] = 0.5 + jnp.abs(0.1 * jax.random.normal(ks[2 + 3 * i - 3], (c,), jnp.float32))
    return p


# ------------------------------ forward wrapper ------------------------------ #

def bottleneck_forward(x_nchw, params, *, tile_h=8, compute_dtype=jnp.float32):
    """Bottleneck forward (stride=1, downsample=None). Input/output: NCHW f32.

    compute_dtype=jnp.bfloat16 halves HBM/VMEM matmul-operand traffic on v6e/v7x
    (accumulation stays f32; bias/ReLU/residual epilogue stays f32).
    """
    N, Cin, H, W = x_nchw.shape
    planes = params["conv1_w"].shape[0]
    Cout = params["conv3_w"].shape[0]
    assert Cout == Cin, "stride=1 / downsample=None requires inplanes == planes*4"
    TH = _pick_tile_h(H, tile_h)

    Cinp = _round_up(Cin)
    Cp = _round_up(planes)
    Coutp = _round_up(Cout)
    assert Cinp == Coutp

    # Layout glue: NCHW -> NHWC, pad channels to lane multiples (128).
    # (In an NHWC end-to-end model these transposes disappear entirely.)
    x = jnp.transpose(x_nchw, (0, 2, 3, 1)).astype(jnp.float32)
    x = jnp.pad(x, ((0, 0), (0, 0), (0, 0), (0, Cinp - Cin)))

    # Fold BN running stats into per-channel scale/bias, then fold the scales
    # into the conv weights (y = x @ (w * s) + b): in-kernel epilogue is bias+relu.
    s1, b1 = _fold_bn(params["bn1_gamma"], params["bn1_beta"],
                      params["bn1_mean"], params["bn1_var"])
    s2, b2 = _fold_bn(params["bn2_gamma"], params["bn2_beta"],
                      params["bn2_mean"], params["bn2_var"])
    s3, b3 = _fold_bn(params["bn3_gamma"], params["bn3_beta"],
                      params["bn3_mean"], params["bn3_var"])

    # Weights: OIHW -> matmul layout, BN-scale folded, zero-padded lane-dense.
    w1 = params["conv1_w"][:, :, 0, 0].T * s1[None, :]                    # (Cin, planes)
    w1 = jnp.pad(w1, ((0, Cinp - Cin), (0, Cp - planes))).astype(compute_dtype)
    w2 = jnp.transpose(params["conv2_w"], (2, 3, 1, 0)) * s2              # (3,3,planes,planes)
    w2 = jnp.pad(w2, ((0, 0), (0, 0), (0, Cp - planes), (0, Cp - planes)))
    w2 = w2.reshape(9 * Cp, Cp).astype(compute_dtype)                     # (9*Cp, Cp)
    w3 = params["conv3_w"][:, :, 0, 0].T * s3[None, :]                    # (planes, Cout)
    w3 = jnp.pad(w3, ((0, Cp - planes), (0, Coutp - Cout))).astype(compute_dtype)

    b1 = _pad_bias(b1, Cp)
    b2 = _pad_bias(b2, Cp)
    b3 = _pad_bias(b3, Coutp)

    grid = (N, H // TH)
    const = lambda n, h: (0, 0)          # weights / biases: DMA'd once, resident

    in_specs = [
        # activation tile (TH rows)
        pl.BlockSpec((None, TH, W, Cinp), lambda n, h: (n, h, 0, 0)),
        # halo row above / below the tile (clamped; masked in-kernel at borders)
        pl.BlockSpec((None, 1, W, Cinp),
                     lambda n, h: (n, jnp.maximum(h * TH - 1, 0), 0, 0)),
        pl.BlockSpec((None, 1, W, Cinp),
                     lambda n, h: (n, jnp.minimum(h * TH + TH, H - 1), 0, 0)),
        pl.BlockSpec((Cinp, Cp), const),         # w1 (BN1 scale folded)
        pl.BlockSpec((9 * Cp, Cp), const),       # w2 (flattened 3x3, BN2 scale folded)
        pl.BlockSpec((Cp, Coutp), const),        # w3 (BN3 scale folded)
        pl.BlockSpec((1, Cp), const),            # b1
        pl.BlockSpec((1, Cp), const),            # b2
        pl.BlockSpec((1, Coutp), const),         # b3
    ]
    out_specs = pl.BlockSpec((None, TH, W, Coutp), lambda n, h: (n, h, 0, 0))

    # Advisory cost estimate so XLA schedules the surrounding ops sensibly.
    M = N * H * W
    flops = 2 * M * (Cinp * Cp + 9 * Cp * Cp + Cp * Coutp)
    itemsize = jnp.dtype(compute_dtype).itemsize
    bytes_accessed = (x.size * 4 + M * Coutp * 4
                      + (w1.size + w2.size + w3.size) * itemsize
                      + (2 * Cp + Coutp) * 4)
    cost = pl.CostEstimate(flops=int(flops), transcendentals=0,
                           bytes_accessed=int(bytes_accessed))

    out = pl.pallas_call(
        _bottleneck_kernel,
        out_shape=jax.ShapeDtypeStruct((N, H, W, Coutp), jnp.float32),
        grid=grid,
        in_specs=in_specs,
        out_specs=out_specs,
        compiler_params=pltpu.CompilerParams(
            dimension_semantics=("parallel", "parallel"),
            vmem_limit_bytes=48 * 1024 * 1024),   # < 64 MiB (v7x physical) everywhere
        cost_estimate=cost,
    )(x, x, x, w1, w2, w3, b1, b2, b3)

    # NHWC (padded channels) -> NCHW, drop channel padding.
    return jnp.transpose(out[..., :Cout], (0, 3, 1, 2))


# ------------------------------- JAX reference ------------------------------- #

def _bn_ref(x_nchw, gamma, beta, mean, var, eps=1e-5):
    sh = (1, -1, 1, 1)
    return (x_nchw - mean.reshape(sh)) / jnp.sqrt(var.reshape(sh) + eps) \
        * gamma.reshape(sh) + beta.reshape(sh)


def bottleneck_ref(x, p):
    conv = lambda a, w, pad: jax.lax.conv_general_dilated(
        a, w, (1, 1), [(pad, pad), (pad, pad)],
        dimension_numbers=("NCHW", "OIHW", "NCHW"))
    out = jax.nn.relu(_bn_ref(conv(x, p["conv1_w"], 0),
                              p["bn1_gamma"], p["bn1_beta"], p["bn1_mean"], p["bn1_var"]))
    out = jax.nn.relu(_bn_ref(conv(out, p["conv2_w"], 1),
                              p["bn2_gamma"], p["bn2_beta"], p["bn2_mean"], p["bn2_var"]))
    out = _bn_ref(conv(out, p["conv3_w"], 0),
                  p["bn3_gamma"], p["bn3_beta"], p["bn3_mean"], p["bn3_var"])
    return jax.nn.relu(out + x)


# ----------------------------------- main ------------------------------------ #

if __name__ == "__main__":
    key = jax.random.PRNGKey(0)
    k_x, k_p = jax.random.split(key)

    planes = 4
    inplanes = planes * 4          # expansion=4, downsample=None => residual must match
    N, H, W = 2, 16, 16

    x = jax.random.normal(k_x, (N, inplanes, H, W), jnp.float32)
    params = init_params(k_p, inplanes, planes)

    fwd = jax.jit(functools.partial(bottleneck_forward, tile_h=8,
                                    compute_dtype=jnp.float32))
    out = jax.block_until_ready(fwd(x, params))

    ref = bottleneck_ref(x, params)
    assert out.shape == (N, inplanes, H, W)
    err = float(jnp.max(jnp.abs(out - ref)))
    assert jnp.allclose(out, ref, atol=1e-4, rtol=1e-4), f"max abs err {err}"

    print("KERNEL_OK")
</pallas_src>

<mosaic_0001>
module attributes {stable_mosaic.version = 11 : i64} {
  func.func @_bottleneck_kernel(%arg0: i32, %arg1: i32, %arg2: memref<1x8x16x128xf32, #tpu.memory_space<vmem>>, %arg3: memref<1x1x16x128xf32, #tpu.memory_space<vmem>>, %arg4: memref<1x1x16x128xf32, #tpu.memory_space<vmem>>, %arg5: memref<128x128xf32, #tpu.memory_space<vmem>>, %arg6: memref<1152x128xf32, #tpu.memory_space<vmem>>, %arg7: memref<128x128xf32, #tpu.memory_space<vmem>>, %arg8: memref<1x128xf32, #tpu.memory_space<vmem>>, %arg9: memref<1x128xf32, #tpu.memory_space<vmem>>, %arg10: memref<1x128xf32, #tpu.memory_space<vmem>>, %arg11: memref<1x8x16x128xf32, #tpu.memory_space<vmem>>) attributes {dimension_semantics = [#tpu.dimension_semantics<parallel>, #tpu.dimension_semantics<parallel>], iteration_bounds = array<i64: 2, 2>, scalar_prefetch = 0 : i64, scratch_operands = 0 : i64, tpu.core_type = #tpu.core_type<tc>, window_params = [{transform_indices = @transform_0, window_bounds = array<i64: 1, 8, 16, 128>}, {transform_indices = @transform_1, window_bounds = array<i64: 1, 1, 16, 128>}, {transform_indices = @transform_2, window_bounds = array<i64: 1, 1, 16, 128>}, {pipeline_mode = #tpu.pipeline_mode<synchronous>, transform_indices = @transform_3, window_bounds = array<i64: 128, 128>}, {pipeline_mode = #tpu.pipeline_mode<synchronous>, transform_indices = @transform_4, window_bounds = array<i64: 1152, 128>}, {pipeline_mode = #tpu.pipeline_mode<synchronous>, transform_indices = @transform_5, window_bounds = array<i64: 128, 128>}, {pipeline_mode = #tpu.pipeline_mode<synchronous>, transform_indices = @transform_6, window_bounds = array<i64: 1, 128>}, {pipeline_mode = #tpu.pipeline_mode<synchronous>, transform_indices = @transform_7, window_bounds = array<i64: 1, 128>}, {pipeline_mode = #tpu.pipeline_mode<synchronous>, transform_indices = @transform_8, window_bounds = array<i64: 1, 128>}, {transform_indices = @transform_9, window_bounds = array<i64: 1, 8, 16, 128>}]} {
    %c0 = arith.constant 0 : index
    %c0_0 = arith.constant 0 : index
    %c0_1 = arith.constant 0 : index
    %c0_2 = arith.constant 0 : index
    %0 = vector.load %arg2[%c0, %c0_0, %c0_1, %c0_2] : memref<1x8x16x128xf32, #tpu.memory_space<vmem>>, vector<1x8x16x128xf32>
    %1 = vector.shape_cast %0 : vector<1x8x16x128xf32> to vector<8x16x128xf32>
    %2 = vector.shape_cast %1 : vector<8x16x128xf32> to vector<128x128xf32>
    %c0_3 = arith.constant 0 : index
    %c0_4 = arith.constant 0 : index
    %3 = vector.load %arg5[%c0_3, %c0_4] : memref<128x128xf32, #tpu.memory_space<vmem>>, vector<128x128xf32>
    %cst = arith.constant dense<0.000000e+00> : vector<128x128xf32>
    %4 = tpu.matmul %2, %3, %cst {dimension_numbers = #tpu.dot_dimension_numbers<[1], [0], [0], [1], [0, 0, 1, 1], [], []>} : vector<128x128xf32>, vector<128x128xf32>, vector<128x128xf32> -> vector<128x128xf32>
    %c0_5 = arith.constant 0 : index
    %c0_6 = arith.constant 0 : index
    %5 = vector.load %arg8[%c0_5, %c0_6] : memref<1x128xf32, #tpu.memory_space<vmem>>, vector<1x128xf32>
    %6 = vector.broadcast %5 : vector<1x128xf32> to vector<128x128xf32>
    %7 = arith.addf %4, %6 : vector<128x128xf32>
    %cst_7 = arith.constant 0.000000e+00 : f32
    %8 = vector.broadcast %cst_7 : f32 to vector<128x128xf32>
    %9 = arith.maximumf %7, %8 : vector<128x128xf32>
    %10 = vector.shape_cast %9 : vector<128x128xf32> to vector<8x16x128xf32>
    %c0_8 = arith.constant 0 : index
    %c0_9 = arith.constant 0 : index
    %c0_10 = arith.constant 0 : index
    %c0_11 = arith.constant 0 : index
    %11 = vector.load %arg3[%c0_8, %c0_9, %c0_10, %c0_11] : memref<1x1x16x128xf32, #tpu.memory_space<vmem>>, vector<1x1x16x128xf32>
    %12 = vector.shape_cast %11 : vector<1x1x16x128xf32> to vector<1x16x128xf32>
    %13 = vector.shape_cast %12 : vector<1x16x128xf32> to vector<16x128xf32>
    %c0_12 = arith.constant 0 : index
    %c0_13 = arith.constant 0 : index
    %14 = vector.load %arg5[%c0_12, %c0_13] : memref<128x128xf32, #tpu.memory_space<vmem>>, vector<128x128xf32>
    %cst_14 = arith.constant dense<0.000000e+00> : vector<16x128xf32>
    %15 = tpu.matmul %13, %14, %cst_14 {dimension_numbers = #tpu.dot_dimension_numbers<[1], [0], [0], [1], [0, 0, 1, 1], [], []>} : vector<16x128xf32>, vector<128x128xf32>, vector<16x128xf32> -> vector<16x128xf32>
    %c0_15 = arith.constant 0 : index
    %c0_16 = arith.constant 0 : index
    %16 = vector.load %arg8[%c0_15, %c0_16] : memref<1x128xf32, #tpu.memory_space<vmem>>, vector<1x128xf32>
    %17 = vector.broadcast %16 : vector<1x128xf32> to vector<16x128xf32>
    %18 = arith.addf %15, %17 : vector<16x128xf32>
    %cst_17 = arith.constant 0.000000e+00 : f32
    %19 = vector.broadcast %cst_17 : f32 to vector<16x128xf32>
    %20 = arith.maximumf %18, %19 : vector<16x128xf32>
    %c0_18 = arith.constant 0 : index
    %c0_19 = arith.constant 0 : index
    %c0_20 = arith.constant 0 : index
    %c0_21 = arith.constant 0 : index
    %21 = vector.load %arg4[%c0_18, %c0_19, %c0_20, %c0_21] : memref<1x1x16x128xf32, #tpu.memory_space<vmem>>, vector<1x1x16x128xf32>
    %22 = vector.shape_cast %21 : vector<1x1x16x128xf32> to vector<1x16x128xf32>
    %23 = vector.shape_cast %22 : vector<1x16x128xf32> to vector<16x128xf32>
    %c0_22 = arith.constant 0 : index
    %c0_23 = arith.constant 0 : index
    %24 = vector.load %arg5[%c0_22, %c0_23] : memref<128x128xf32, #tpu.memory_space<vmem>>, vector<128x128xf32>
    %cst_24 = arith.constant dense<0.000000e+00> : vector<16x128xf32>
    %25 = tpu.matmul %23, %24, %cst_24 {dimension_numbers = #tpu.dot_dimension_numbers<[1], [0], [0], [1], [0, 0, 1, 1], [], []>} : vector<16x128xf32>, vector<128x128xf32>, vector<16x128xf32> -> vector<16x128xf32>
    %c0_25 = arith.constant 0 : index
    %c0_26 = arith.constant 0 : index
    %26 = vector.load %arg8[%c0_25, %c0_26] : memref<1x128xf32, #tpu.memory_space<vmem>>, vector<1x128xf32>
    %27 = vector.broadcast %26 : vector<1x128xf32> to vector<16x128xf32>
    %28 = arith.addf %25, %27 : vector<16x128xf32>
    %cst_27 = arith.constant 0.000000e+00 : f32
    %29 = vector.broadcast %cst_27 : f32 to vector<16x128xf32>
    %30 = arith.maximumf %28, %29 : vector<16x128xf32>
    %c0_i32 = arith.constant 0 : i32
    %31 = arith.cmpi sgt, %arg1, %c0_i32 : i32
    %32 = arith.extui %31 : i1 to i32
    %33 = arith.sitofp %32 : i32 to f32
    %34 = vector.broadcast %33 : f32 to vector<16x128xf32>
    %35 = arith.mulf %20, %34 : vector<16x128xf32>
    %c1_i32 = arith.constant 1 : i32
    %36 = arith.cmpi slt, %arg1, %c1_i32 : i32
    %37 = arith.extui %36 : i1 to i32
    %38 = arith.sitofp %37 : i32 to f32
    %39 = vector.broadcast %38 : f32 to vector<16x128xf32>
    %40 = arith.mulf %30, %39 : vector<16x128xf32>
    %41 = vector.shape_cast %35 : vector<16x128xf32> to vector<1x16x128xf32>
    %42 = vector.shape_cast %40 : vector<16x128xf32> to vector<1x16x128xf32>
    %43 = tpu.concatenate %41, %10, %42 in 0 : vector<1x16x128xf32>, vector<8x16x128xf32>, vector<1x16x128xf32> -> vector<10x16x128xf32>
    %cst_28 = arith.constant 0.000000e+00 : f32
    %44 = vector.broadcast %cst_28 : f32 to vector<10x1x128xf32>
    %45 = tpu.concatenate %44, %43, %44 in 1 : vector<10x1x128xf32>, vector<10x16x128xf32>, vector<10x1x128xf32> -> vector<10x18x128xf32>
    %46 = vector.extract_strided_slice %45 {offsets = [0, 0, 0], sizes = [8, 16, 128], strides = [1, 1, 1]} : vector<10x18x128xf32> to vector<8x16x128xf32>
    %47 = vector.extract_strided_slice %45 {offsets = [0, 1, 0], sizes = [8, 16, 128], strides = [1, 1, 1]} : vector<10x18x128xf32> to vector<8x16x128xf32>
    %48 = vector.extract_strided_slice %45 {offsets = [0, 2, 0], sizes = [8, 16, 128], strides = [1, 1, 1]} : vector<10x18x128xf32> to vector<8x16x128xf32>
    %49 = vector.extract_strided_slice %45 {offsets = [1, 0, 0], sizes = [8, 16, 128], strides = [1, 1, 1]} : vector<10x18x128xf32> to vector<8x16x128xf32>
    %50 = vector.extract_strided_slice %45 {offsets = [1, 1, 0], sizes = [8, 16, 128], strides = [1, 1, 1]} : vector<10x18x128xf32> to vector<8x16x128xf32>
    %51 = vector.extract_strided_slice %45 {offsets = [1, 2, 0], sizes = [8, 16, 128], strides = [1, 1, 1]} : vector<10x18x128xf32> to vector<8x16x128xf32>
    %52 = vector.extract_strided_slice %45 {offsets = [2, 0, 0], sizes = [8, 16, 128], strides = [1, 1, 1]} : vector<10x18x128xf32> to vector<8x16x128xf32>
    %53 = vector.extract_strided_slice %45 {offsets = [2, 1, 0], sizes = [8, 16, 128], strides = [1, 1, 1]} : vector<10x18x128xf32> to vector<8x16x128xf32>
    %54 = vector.extract_strided_slice %45 {offsets = [2, 2, 0], sizes = [8, 16, 128], strides = [1, 1, 1]} : vector<10x18x128xf32> to vector<8x16x128xf32>
    %55 = tpu.concatenate %46, %47, %48, %49, %50, %51, %52, %53, %54 in 2 : vector<8x16x128xf32>, vector<8x16x128xf32>, vector<8x16x128xf32>, vector<8x16x128xf32>, vector<8x16x128xf32>, vector<8x16x128xf32>, vector<8x16x128xf32>, vector<8x16x128xf32>, vector<8x16x128xf32> -> vector<8x16x1152xf32>
    %56 = vector.shape_cast %55 : vector<8x16x1152xf32> to vector<128x1152xf32>
    %c0_29 = arith.constant 0 : index
    %c0_30 = arith.constant 0 : index
    %57 = vector.load %arg6[%c0_29, %c0_30] : memref<1152x128xf32, #tpu.memory_space<vmem>>, vector<1152x128xf32>
    %cst_31 = arith.constant dense<0.000000e+00> : vector<128x128xf32>
    %58 = tpu.matmul %56, %57, %cst_31 {dimension_numbers = #tpu.dot_dimension_numbers<[1], [0], [0], [1], [0, 0, 1, 1], [], []>} : vector<128x1152xf32>, vector<1152x128xf32>, vector<128x128xf32> -> vector<128x128xf32>
    %c0_32 = arith.constant 0 : index
    %c0_33 = arith.constant 0 : index
    %59 = vector.load %arg9[%c0_32, %c0_33] : memref<1x128xf32, #tpu.memory_space<vmem>>, vector<1x128xf32>
    %60 = vector.broadcast %59 : vector<1x128xf32> to vector<128x128xf32>
    %61 = arith.addf %58, %60 : vector<128x128xf32>
    %cst_34 = arith.constant 0.000000e+00 : f32
    %62 = vector.broadcast %cst_34 : f32 to vector<128x128xf32>
    %63 = arith.maximumf %61, %62 : vector<128x128xf32>
    %c0_35 = arith.constant 0 : index
    %c0_36 = arith.constant 0 : index
    %64 = vector.load %arg7[%c0_35, %c0_36] : memref<128x128xf32, #tpu.memory_space<vmem>>, vector<128x128xf32>
    %cst_37 = arith.constant dense<0.000000e+00> : vector<128x128xf32>
    %65 = tpu.matmul %63, %64, %cst_37 {dimension_numbers = #tpu.dot_dimension_numbers<[1], [0], [0], [1], [0, 0, 1, 1], [], []>} : vector<128x128xf32>, vector<128x128xf32>, vector<128x128xf32> -> vector<128x128xf32>
    %c0_38 = arith.constant 0 : index
    %c0_39 = arith.constant 0 : index
    %66 = vector.load %arg10[%c0_38, %c0_39] : memref<1x128xf32, #tpu.memory_space<vmem>>, vector<1x128xf32>
    %67 = vector.broadcast %66 : vector<1x128xf32> to vector<128x128xf32>
    %68 = arith.addf %65, %67 : vector<128x128xf32>
    %69 = arith.addf %68, %2 : vector<128x128xf32>
    %cst_40 = arith.constant 0.000000e+00 : f32
    %70 = vector.broadcast %cst_40 : f32 to vector<128x128xf32>
    %71 = arith.maximumf %69, %70 : vector<128x128xf32>
    %72 = vector.shape_cast %71 : vector<128x128xf32> to vector<8x16x128xf32>
    %c0_41 = arith.constant 0 : index
    %c0_42 = arith.constant 0 : index
    %c0_43 = arith.constant 0 : index
    %c0_44 = arith.constant 0 : index
    %73 = vector.load %arg11[%c0_41, %c0_42, %c0_43, %c0_44] : memref<1x8x16x128xf32, #tpu.memory_space<vmem>>, vector<1x8x16x128xf32>
    %74 = vector.shape_cast %73 : vector<1x8x16x128xf32> to vector<8x16x128xf32>
    %75 = vector.shape_cast %72 : vector<8x16x128xf32> to vector<1x8x16x128xf32>
    tpu.vector_store %arg11[%c0_41, %c0_42, %c0_43, %c0_44], %75 {strides = array<i32>} : memref<1x8x16x128xf32, #tpu.memory_space<vmem>>, vector<1x8x16x128xf32>,
    return
  }
  func.func @transform_0(%arg0: i32, %arg1: i32) -> (i32, i32, i32, i32) {
    %c0_i32 = arith.constant 0 : i32
    %c0_i32_0 = arith.constant 0 : i32
    %c0_i32_1 = arith.constant 0 : i32
    return %arg0, %arg1, %c0_i32, %c0_i32_0 : i32, i32, i32, i32
  }
  func.func @transform_1(%arg0: i32, %arg1: i32) -> (i32, i32, i32, i32) {
    %c8_i32 = arith.constant 8 : i32
    %0 = arith.muli %arg1, %c8_i32 : i32
    %c1_i32 = arith.constant 1 : i32
    %1 = arith.subi %0, %c1_i32 : i32
    %c0_i32 = arith.constant 0 : i32
    %2 = arith.maxsi %1, %c0_i32 : i32
    %c0_i32_0 = arith.constant 0 : i32
    %c0_i32_1 = arith.constant 0 : i32
    %c0_i32_2 = arith.constant 0 : i32
    return %arg0, %2, %c0_i32_0, %c0_i32_1 : i32, i32, i32, i32
  }
  func.func @transform_2(%arg0: i32, %arg1: i32) -> (i32, i32, i32, i32) {
    %c8_i32 = arith.constant 8 : i32
    %0 = arith.muli %arg1, %c8_i32 : i32
    %c8_i32_0 = arith.constant 8 : i32
    %1 = arith.addi %0, %c8_i32_0 : i32
    %c15_i32 = arith.constant 15 : i32
    %2 = arith.minsi %1, %c15_i32 : i32
    %c0_i32 = arith.constant 0 : i32
    %c0_i32_1 = arith.constant 0 : i32
    %c0_i32_2 = arith.constant 0 : i32
    return %arg0, %2, %c0_i32, %c0_i32_1 : i32, i32, i32, i32
  }
  func.func @transform_3(%arg0: i32, %arg1: i32) -> (i32, i32) {
    %c0_i32 = arith.constant 0 : i32
    %c0_i32_0 = arith.constant 0 : i32
    %c0_i32_1 = arith.constant 0 : i32
    return %c0_i32, %c0_i32_0 : i32, i32
  }
  func.func @transform_4(%arg0: i32, %arg1: i32) -> (i32, i32) {
    %c0_i32 = arith.constant 0 : i32
    %c0_i32_0 = arith.constant 0 : i32
    %c0_i32_1 = arith.constant 0 : i32
    return %c0_i32, %c0_i32_0 : i32, i32
  }
  func.func @transform_5(%arg0: i32, %arg1: i32) -> (i32, i32) {
    %c0_i32 = arith.constant 0 : i32
    %c0_i32_0 = arith.constant 0 : i32
    %c0_i32_1 = arith.constant 0 : i32
    return %c0_i32, %c0_i32_0 : i32, i32
  }
  func.func @transform_6(%arg0: i32, %arg1: i32) -> (i32, i32) {
    %c0_i32 = arith.constant 0 : i32
    %c0_i32_0 = arith.constant 0 : i32
    %c0_i32_1 = arith.constant 0 : i32
    return %c0_i32, %c0_i32_0 : i32, i32
  }
  func.func @transform_7(%arg0: i32, %arg1: i32) -> (i32, i32) {
    %c0_i32 = arith.constant 0 : i32
    %c0_i32_0 = arith.constant 0 : i32
    %c0_i32_1 = arith.constant 0 : i32
    return %c0_i32, %c0_i32_0 : i32, i32
  }
  func.func @transform_8(%arg0: i32, %arg1: i32) -> (i32, i32) {
    %c0_i32 = arith.constant 0 : i32
    %c0_i32_0 = arith.constant 0 : i32
    %c0_i32_1 = arith.constant 0 : i32
    return %c0_i32, %c0_i32_0 : i32, i32
  }
  func.func @transform_9(%arg0: i32, %arg1: i32) -> (i32, i32, i32, i32) {
    %c0_i32 = arith.constant 0 : i32
    %c0_i32_0 = arith.constant 0 : i32
    %c0_i32_1 = arith.constant 0 : i32
    return %arg0, %arg1, %c0_i32, %c0_i32_0 : i32, i32, i32, i32
  }
}

</mosaic_0001>

<bundles_post_ra>
// kernel: bottleneck_forward.1
= control target key start
LH: loop header
LB: loop body
LE: loop exit
PB: predicated region body
PF: predicated region fallthrough
CT: control target
= control target key end

     0   :  { %s2256_s30 = smov 0   ;;  %s2258_s10 = smov 0   ;;  %s3742_s0 = inlined_call_operand.vmem [shape: f32[2,16,16,128], index: 0, kind: input, shape index: {}, may-alias: {0,1,2}]   ;;  %s3743_s1 = inlined_call_operand.vmem [shape: f32[2,16,16,128], index: 1, kind: input, shape index: {}, may-alias: {0,1,2}]   ;;  %s3744_s2 = inlined_call_operand.vmem [shape: f32[2,16,16,128], index: 2, kind: input, shape index: {}, may-alias: {0,1,2}]   ;;  %s3745_s3 = inlined_call_operand.vmem [shape: f32[128,128], index: 3, kind: input, shape index: {}]   ;;  %s3746_s4 = inlined_call_operand.vmem [shape: f32[1152,128], index: 4, kind: input, shape index: {}]   ;;  %s3747_s5 = inlined_call_operand.vmem [shape: f32[128,128], index: 5, kind: input, shape index: {}]   ;;  %s3748_s6 = inlined_call_operand.vmem [shape: f32[1,128], index: 6, kind: input, shape index: {}]   ;;  %s3749_s7 = inlined_call_operand.vmem [shape: f32[1,128], index: 7, kind: input, shape index: {}]   ;;  %s3750_s8 = inlined_call_operand.vmem [shape: f32[1,128], index: 8, kind: input, shape index: {}]   ;;  %s3751_s9 = inlined_call_operand.vmem [shape: f32[2,16,16,128], index: 9, kind: output, shape index: {}]  }
   0x1   :  { %s2260_s11 = smov 0   ;;  %s2262_s12 = smov 0  }
   0x2   :  { %s2264_s13 = smov 0  }
   0x3 LB: > { %s28_s14 = sadd.s32 1, %s2196_s11  ;;  %s31_s15 = sadd.s32 1, %s2200_s12  ;;  %s2204_s13 = sphi %s2264_s13, %s19_s13   ;;  %s2200_s12 = sphi %s2262_s12, %s3826_s12   ;;  %s2196_s11 = sphi %s2260_s11, %s3825_s11   ;;  %s2192_s10 = sphi %s2258_s10, %s3824_s10   ;;  %s2188_s30 = sphi %s2256_s30, %s3823_s30  }
   0x4   : > { %p29_p0 = scmp.ge.s32.totalorder %s28_s14, 2  ;;  %p1980_p1 = scmp.ge.s32.totalorder %s2204_s13, 1 }
   0x5   : > { %p373_p2 = scmp.lt.s32.totalorder %s2204_s13, 5 }
   0x6   : > { %s3828_s14 = smov (%p29_p0, %s28_s14), 0  ;;  %s3830_s15 = smov (!%p29_p0, %s31_s15), %s2200_s12 }
   0x7   : > { %p374_p3 = pnand %p1980_p1, %p373_p2  ;;  %p33_p4 = scmp.ge.s32.totalorder %s3830_s15, 2 }
   0x9   : > { %s3832_s15 = smov (%p33_p4, %s3830_s15), 0  ;;  %377 = sbr.rel (%p374_p3) target bundleno = 963 (0x3c3), region = 56 }
   0xe   : > { %v532_v0 = vld [vmem:[%s3745_s3 + $0x78] sm:$0xff]  ;;  %v531_v1 = vld [vmem:[%s3745_s3 + $0x70] sm:$0xff]  ;;  %s2297_s20 = sshll.u32 %s2188_s30, 3  ;;  %v530_v2 = vld [vmem:[%s3745_s3 + $0x68] sm:$0xff]  ;;  %p446_p6 = scmp.lt.s32.totalorder %s2192_s10, 1  ;;  %vm704_vm0 = vcmask 1040384  }
   0xf   : > { %537 = vmatpush.msra.mxu0 %v532_v0  ;;  %620 = vmatpush.msra.mxu1 %v532_v0  ;;  %s2303_s23 = sadd.s32 4294967295, %s2297_s20  ;;  %v529_v3 = vld [vmem:[%s3745_s3 + $0x60] sm:$0xff]  ;;  %v528_v4 = vld [vmem:[%s3745_s3 + $0x58] sm:$0xff]  ;;  %v527_v5 = vld [vmem:[%s3745_s3 + $0x50] sm:$0xff]  ;;  %p448_p7 = scmp.lt.s32.totalorder %s2297_s20, 15  ;;  %vm858_vm2 = vcmask 1045504  }
  0x10   : > { %647 = vmatpush.msra.mxu2 %v532_v0  ;;  %p458_p5 = scmp.gt.s32.totalorder %s2303_s23, 0  ;;  %p1987_p8 = scmp.lt.s32.totalorder %s2303_s23, 15  ;;  %v526_v6 = vld [vmem:[%s3745_s3 + $0x48] sm:$0xff]  ;;  %v525_v7 = vld [vmem:[%s3745_s3 + $0x40] sm:$0xff]  ;;  %v524_v8 = vld [vmem:[%s3745_s3 + $0x38] sm:$0xff]  ;;  %vm801_vm3 = vcmask 1046528  }
  0x11   : > { %538 = vmatpush.msra.mxu0 %v531_v1  ;;  %621 = vmatpush.msra.mxu1 %v531_v1  ;;  %s3834_s10 = smov (!%p446_p6, %s2192_s10), 1  ;;  %v523_v9 = vld [vmem:[%s3745_s3 + $0x30] sm:$0xff]  ;;  %v522_v10 = vld [vmem:[%s3745_s3 + $0x28] sm:$0xff]  ;;  %v521_v11 = vld [vmem:[%s3745_s3 + $0x20] sm:$0xff]  ;;  %p672_p9 = scmp.gt.s32.totalorder %s2188_s30, 0 }
  0x12   : > { %648 = vmatpush.msra.mxu2 %v531_v1  ;;  %s459_s16 = scalar_select %p458_p5, %s2303_s23, 0  ;;  %v520_v12 = vld [vmem:[%s3745_s3 + $0x18] sm:$0xff]  ;;  %v519_v13 = vld [vmem:[%s3745_s3 + $0x10] sm:$0xff]  ;;  %v518_v14 = vld [vmem:[%s3745_s3 + $0x8] sm:$0xff] }
  0x13   : > { %539 = vmatpush.msra.mxu0 %v530_v2  ;;  %622 = vmatpush.msra.mxu1 %v530_v2  ;;  %s449_s22 = scalar_select %p448_p7, %s2297_s20, 15  ;;  %v517_v15 = vld [vmem:[%s3745_s3] sm:$0xff]  ;;  %v1010_v27 = vld [vmem:[%s3746_s4 + $0x1f8] sm:$0xff]  ;;  %v1009_v28 = vld [vmem:[%s3746_s4 + $0x1f0] sm:$0xff] }
  0x14   : > { %649 = vmatpush.msra.mxu2 %v530_v2  ;;  %s3836_s16 = smov (!%p1987_p8, %s459_s16), 15  ;;  %s2335_s28 = sshll.u32 %s3834_s10, 5  ;;  %v962_v30 = vld [vmem:[%s3746_s4 + $0x78] sm:$0xff]  ;;  %v1008_v31 = vld [vmem:[%s3746_s4 + $0x1e8] sm:$0xff]  ;;  %v961_v32 = vld [vmem:[%s3746_s4 + $0x70] sm:$0xff] }
  0x15   : > { %540 = vmatpush.msra.mxu0 %v529_v3  ;;  %623 = vmatpush.msra.mxu1 %v529_v3  ;;  %s1982_s23 = sshll.u32 %s449_s22, 1  ;;  %s1992_s29 = sshll.u32 %s3836_s16, 1  ;;  %v1007_v33 = vld [vmem:[%s3746_s4 + $0x1e0] sm:$0xff]  ;;  %v960_v34 = vld [vmem:[%s3746_s4 + $0x68] sm:$0xff]  ;;  %v1006_v35 = vld [vmem:[%s3746_s4 + $0x1d8] sm:$0xff] }
  0x16   : > { %650 = vmatpush.msra.mxu2 %v529_v3  ;;  %s2344_s10 = sadd.s32 %s2335_s28, %s1982_s23  ;;  %s466_s24 = sadd.s32 %s1992_s29, %s2335_s28  ;;  %1095 = vmatpush.msra.mxu3 %v962_v30  ;;  %v959_v36 = vld [vmem:[%s3746_s4 + $0x60] sm:$0xff]  ;;  %v1005_v37 = vld [vmem:[%s3746_s4 + $0x1d0] sm:$0xff]  ;;  %v958_v39 = vld [vmem:[%s3746_s4 + $0x58] sm:$0xff] }
  0x17   : > { %541 = vmatpush.msra.mxu0 %v528_v4  ;;  %624 = vmatpush.msra.mxu1 %v528_v4  ;;  %s1984_s25 = sshll.u32 %s2344_s10, 3  ;;  %s1994_s26 = sshll.u32 %s466_s24, 3  ;;  %v1004_v40 = vld [vmem:[%s3746_s4 + $0x1c8] sm:$0xff]  ;;  %v957_v41 = vld [vmem:[%s3746_s4 + $0x50] sm:$0xff]  ;;  %v978_v42 = vld [vmem:[%s3746_s4 + $0xf8] sm:$0xff] }
  0x18   : > { %651 = vmatpush.msra.mxu2 %v528_v4  ;;  %s2362_s21 = scalar_lea.vmem %s3742_s0, %s1984_s25  ;;  %s468_s24 = scalar_lea.vmem %s3743_s1, %s1994_s26  ;;  %1096 = vmatpush.msra.mxu3 %v961_v32  ;;  %v1003_v43 = vld [vmem:[%s3746_s4 + $0x1c0] sm:$0xff]  ;;  %v956_v44 = vld [vmem:[%s3746_s4 + $0x48] sm:$0xff]  ;;  %v977_v45 = vld [vmem:[%s3746_s4 + $0xf0] sm:$0xff] }
  0x19   : > { %542 = vmatpush.msra.mxu0 %v527_v5  ;;  %625 = vmatpush.msra.mxu1 %v527_v5  ;;  %v501_v16 = vld [vmem:[%s2362_s21] sm:$0xff]  ;;  %v502_v18 = vld [vmem:[%s2362_s21 + $0x8] sm:$0xff]  ;;  %v503_v20 = vld [vmem:[%s2362_s21 + $0x10] sm:$0xff]  ;;  %s673_s22 = scalar_select %p672_p9, 1, 0 }
  0x1a   : > { %652 = vmatpush.msra.mxu2 %v527_v5  ;;  %v618_v17 = vld [vmem:[%s468_s24] sm:$0xff]  ;;  %v619_v19 = vld [vmem:[%s468_s24 + $0x8] sm:$0xff]  ;;  %v504_v21 = vld [vmem:[%s2362_s21 + $0x18] sm:$0xff]  ;;  %1097 = vmatpush.msra.mxu3 %v960_v34  ;;  %s474_s26 = sadd.s32 8, %s2297_s20  ;;  %p678_p11 = scmp.lt.s32.totalorder %s2188_s30, 1 }
  0x1b   : > { %543 = vmatpush.msra.mxu0 %v526_v6  ;;  %626 = vmatpush.msra.mxu1 %v526_v6  ;;  %v505_v22 = vld [vmem:[%s2362_s21 + $0x20] sm:$0xff]  ;;  %v506_v23 = vld [vmem:[%s2362_s21 + $0x28] sm:$0xff]  ;;  %v507_v24 = vld [vmem:[%s2362_s21 + $0x30] sm:$0xff]  ;;  %s674_s17 = scvt.s32.f32 %s673_s22  ;;  %p2539_p10 = scmp.lt.s32.totalorder %s474_s26, 15 }
  0x1c   : > { %653 = vmatpush.msra.mxu2 %v526_v6  ;;  %v508_v25 = vld [vmem:[%s2362_s21 + $0x38] sm:$0xff]  ;;  %v509_v26 = vld [vmem:[%s2362_s21 + $0x40] sm:$0xff]  ;;  %v510_v29 = vld [vmem:[%s2362_s21 + $0x48] sm:$0xff]  ;;  %1098 = vmatpush.msra.mxu3 %v959_v36  ;;  %s679_s27 = scalar_select %p678_p11, 1, 0 }
  0x1d   : > { %544 = vmatpush.msra.mxu0 %v525_v7  ;;  %627 = vmatpush.msra.mxu1 %v525_v7  ;;  %v511_v38 = vld [vmem:[%s2362_s21 + $0x50] sm:$0xff]  ;;  %v1002_v46 = vld [vmem:[%s3746_s4 + $0x1b8] sm:$0xff]  ;;  %v976_v47 = vld [vmem:[%s3746_s4 + $0xe8] sm:$0xff]  ;;  %s3838_s26 = smov (!%p2539_p10, %s474_s26), 15 }
  0x1e   : > { %654 = vmatpush.msra.mxu2 %v525_v7  ;;  %1099 = vmatpush.msra.mxu3 %v958_v39  ;;  %v955_v48 = vld [vmem:[%s3746_s4 + $0x40] sm:$0xff]  ;;  %v1001_v49 = vld [vmem:[%s3746_s4 + $0x1b0] sm:$0xff]  ;;  %v512_v50 = vld [vmem:[%s2362_s21 + $0x58] sm:$0xff]  ;;  %s3840_s26 = smov (!%p2539_p10, %s3838_s26), 15  ;;  %s680_s30 = scvt.s32.f32 %s679_s27 }
  0x1f   : > { %545 = vmatpush.msra.mxu0 %v524_v8  ;;  %628 = vmatpush.msra.mxu1 %v524_v8  ;;  %v954_v51 = vld [vmem:[%s3746_s4 + $0x38] sm:$0xff]  ;;  %v975_v52 = vld [vmem:[%s3746_s4 + $0xe0] sm:$0xff]  ;;  %v1000_v53 = vld [vmem:[%s3746_s4 + $0x1a8] sm:$0xff]  ;;  %s1999_s20 = sshll.u32 %s3840_s26, 1 }
  0x20   : > { %655 = vmatpush.msra.mxu2 %v524_v8  ;;  %1100 = vmatpush.msra.mxu3 %v957_v41  ;;  %v953_v54 = vld [vmem:[%s3746_s4 + $0x30] sm:$0xff]  ;;  %v974_v55 = vld [vmem:[%s3746_s4 + $0xd8] sm:$0xff]  ;;  %v999_v56 = vld [vmem:[%s3746_s4 + $0x1a0] sm:$0xff]  ;;  %s483_s29 = sadd.s32 %s1999_s20, %s2335_s28 }
  0x21   : > { %546 = vmatpush.msra.mxu0 %v523_v9  ;;  %629 = vmatpush.msra.mxu1 %v523_v9  ;;  %v952_v57 = vld [vmem:[%s3746_s4 + $0x28] sm:$0xff]  ;;  %v973_v58 = vld [vmem:[%s3746_s4 + $0xd0] sm:$0xff]  ;;  %v998_v59 = vld [vmem:[%s3746_s4 + $0x198] sm:$0xff]  ;;  %s2001_s18 = sshll.u32 %s483_s29, 3 }
  0x22   : > { %656 = vmatpush.msra.mxu2 %v523_v9  ;;  %1101 = vmatpush.msra.mxu3 %v956_v44  ;;  %v513_v60 = vld [vmem:[%s2362_s21 + $0x60] sm:$0xff]  ;;  %v972_v62 = vld [vmem:[%s3746_s4 + $0xc8] sm:$0xff]  ;;  %v997_v63 = vld [vmem:[%s3746_s4 + $0x190] sm:$0xff]  ;;  %s485_s16 = scalar_lea.vmem %s3744_s2, %s2001_s18 }
  0x23   : > { %547 = vmatpush.msra.mxu0 %v522_v10  ;;  %630 = vmatpush.msra.mxu1 %v522_v10  ;;  %v951_v61 = vld [vmem:[%s3746_s4 + $0x20] sm:$0xff]  ;;  %v950_v0 = vld [vmem:[%s3746_s4 + $0x18] sm:$0xff]  ;;  %v996_v2 = vld [vmem:[%s3746_s4 + $0x188] sm:$0xff] }
  0x24   : > { %657 = vmatpush.msra.mxu2 %v522_v10  ;;  %1102 = vmatpush.msra.mxu3 %v955_v48  ;;  %v971_v1 = vld [vmem:[%s3746_s4 + $0xc0] sm:$0xff]  ;;  %v949_v3 = vld [vmem:[%s3746_s4 + $0x10] sm:$0xff]  ;;  %v970_v4 = vld [vmem:[%s3746_s4 + $0xb8] sm:$0xff] }
  0x25   : > { %548 = vmatpush.msra.mxu0 %v521_v11  ;;  %631 = vmatpush.msra.mxu1 %v521_v11  ;;  %v995_v5 = vld [vmem:[%s3746_s4 + $0x180] sm:$0xff]  ;;  %v948_v6 = vld [vmem:[%s3746_s4 + $0x8] sm:$0xff]  ;;  %v969_v7 = vld [vmem:[%s3746_s4 + $0xb0] sm:$0xff] }
  0x26   : > { %658 = vmatpush.msra.mxu2 %v521_v11  ;;  %1103 = vmatpush.msra.mxu3 %v954_v51  ;;  %v514_v8 = vld [vmem:[%s2362_s21 + $0x68] sm:$0xff]  ;;  %v947_v9 = vld [vmem:[%s3746_s4] sm:$0xff]  ;;  %vm2544_vm1 = vmneg %vm704_vm0 }
  0x27   : > { %549 = vmatpush.msra.mxu0 %v520_v12  ;;  %632 = vmatpush.msra.mxu1 %v520_v12  ;;  %v968_v10 = vld [vmem:[%s3746_s4 + $0xa8] sm:$0xff]  ;;  %v967_v11 = vld [vmem:[%s3746_s4 + $0xa0] sm:$0xff] }
  0x28   : > { %659 = vmatpush.msra.mxu2 %v520_v12  ;;  %1104 = vmatpush.msra.mxu3 %v953_v54  ;;  %v966_v12 = vld [vmem:[%s3746_s4 + $0x98] sm:$0xff] }
  0x29   : > { %550 = vmatpush.msra.mxu0 %v519_v13  ;;  %633 = vmatpush.msra.mxu1 %v519_v13 }
  0x2a   : > { %660 = vmatpush.msra.mxu2 %v519_v13  ;;  %1105 = vmatpush.msra.mxu3 %v952_v57  ;;  %v965_v13 = vld [vmem:[%s3746_s4 + $0x90] sm:$0xff] }
  0x2b   : > { %551 = vmatpush.msra.mxu0 %v518_v14  ;;  %634 = vmatpush.msra.mxu1 %v518_v14 }
  0x2c   : > { %661 = vmatpush.msra.mxu2 %v518_v14  ;;  %1106 = vmatpush.msra.mxu3 %v951_v61  ;;  %v515_v14 = vld [vmem:[%s2362_s21 + $0x70] sm:$0xff] }
  0x2d   : > { %552 = vmatpush.msra.mxu0 %v517_v15  ;;  %635 = vmatpush.msra.mxu1 %v517_v15 }
  0x2e   : > { %553 = vmatmul.f32.vlgmr.msra.gmra.mxu0 %v501_v16  ;;  %636 = vmatmul.f32.vlgmr.msra.gmra.mxu1 %v618_v17  ;;  %v963_v16 = vld [vmem:[%s3746_s4 + $0x80] sm:$0xff]  ;;  %v516_v17 = vld [vmem:[%s2362_s21 + $0x78] sm:$0xff] }
  0x2f   : > { %662 = vmatpush.msra.mxu2 %v517_v15  ;;  %1290 = vmatpush.msrb.mxu0 %v1010_v27  ;;  %v964_v15 = vld [vmem:[%s3746_s4 + $0x88] sm:$0xff] }
  0x30   : > { %1160 = vmatpush.msrb.mxu1 %v978_v42  ;;  %1107 = vmatpush.msra.mxu3 %v950_v0 }
  0x31   : > { %1291 = vmatpush.msrb.mxu0 %v1009_v28  ;;  %2058 = vmatpush.msrb.mxu2 %v978_v42 }
  0x32   : > { %1161 = vmatpush.msrb.mxu1 %v977_v45  ;;  %1108 = vmatpush.msra.mxu3 %v949_v3 }
  0x33   : > { %1292 = vmatpush.msrb.mxu0 %v1008_v31  ;;  %2059 = vmatpush.msrb.mxu2 %v977_v45 }
  0x34   : > { %1162 = vmatpush.msrb.mxu1 %v976_v47  ;;  %1109 = vmatpush.msra.mxu3 %v948_v6  ;;  %v646_v6 = vld [vmem:[%s485_s16 + $0x8] sm:$0xff] }
  0x35   : > { %1293 = vmatpush.msrb.mxu0 %v1007_v33  ;;  %2060 = vmatpush.msrb.mxu2 %v976_v47 }
  0x36   : > { %556 = vmatmul.f32.gmra.mxu0 %v502_v18  ;;  %639 = vmatmul.f32.gmra.mxu1 %v619_v19  ;;  %v2534_v18 = vld [vmem:[%s3748_s6] ss:$0 sm:$0xff] }
  0x37   : > { %1294 = vmatpush.msrb.mxu0 %v1006_v35  ;;  %1163 = vmatpush.msrb.mxu1 %v975_v52 }
  0x38   : > { %2061 = vmatpush.msrb.mxu2 %v975_v52  ;;  %1110 = vmatpush.msra.mxu3 %v947_v9  ;;  %v1042_v9 = vld [vmem:[%s3746_s4 + $0x2f8] sm:$0xff] }
  0x39   : > { %1295 = vmatpush.msrb.mxu0 %v1005_v37  ;;  %1164 = vmatpush.msrb.mxu1 %v974_v55 }
  0x3a   : > { %2062 = vmatpush.msrb.mxu2 %v974_v55 }
  0x3b   : > { %1296 = vmatpush.msrb.mxu0 %v1004_v40  ;;  %1165 = vmatpush.msrb.mxu1 %v973_v58 }
  0x3c   : > { %2063 = vmatpush.msrb.mxu2 %v973_v58 }
  0x3d   : > { %1297 = vmatpush.msrb.mxu0 %v1003_v43  ;;  %1166 = vmatpush.msrb.mxu1 %v972_v62 }
  0x3e   : > { %559 = vmatmul.f32.gmra.mxu0 %v503_v20  ;;  %2064 = vmatpush.msrb.mxu2 %v972_v62  ;;  %v645_v62 = vld [vmem:[%s485_s16] sm:$0xff] }
  0x3f   : > { %1298 = vmatpush.msrb.mxu0 %v1002_v46  ;;  %1167 = vmatpush.msrb.mxu1 %v971_v1 }
  0x40   : > { %2065 = vmatpush.msrb.mxu2 %v971_v1 }
  0x41   : > { %1299 = vmatpush.msrb.mxu0 %v1001_v49  ;;  %1168 = vmatpush.msrb.mxu1 %v970_v4 }
  0x42   : > { %2066 = vmatpush.msrb.mxu2 %v970_v4 }
  0x43   : > { %1300 = vmatpush.msrb.mxu0 %v1000_v53  ;;  %1169 = vmatpush.msrb.mxu1 %v969_v7 }
  0x44   : > { %2067 = vmatpush.msrb.mxu2 %v969_v7 }
  0x45   : > { %1301 = vmatpush.msrb.mxu0 %v999_v56  ;;  %1170 = vmatpush.msrb.mxu1 %v968_v10 }
  0x46   : > { %562 = vmatmul.f32.gmra.mxu0 %v504_v21  ;;  %2068 = vmatpush.msrb.mxu2 %v968_v10 }
  0x47   : > { %1302 = vmatpush.msrb.mxu0 %v998_v59  ;;  %1171 = vmatpush.msrb.mxu1 %v967_v11 }
  0x48   : > { %2069 = vmatpush.msrb.mxu2 %v967_v11 }
  0x49   : > { %1303 = vmatpush.msrb.mxu0 %v997_v63  ;;  %1172 = vmatpush.msrb.mxu1 %v966_v12 }
  0x4a   : > { %2070 = vmatpush.msrb.mxu2 %v966_v12  ;;  %v1041_v12 = vld [vmem:[%s3746_s4 + $0x2f0] sm:$0xff] }
  0x4b   : > { %1304 = vmatpush.msrb.mxu0 %v996_v2  ;;  %1173 = vmatpush.msrb.mxu1 %v965_v13 }
  0x4c   : > { %2071 = vmatpush.msrb.mxu2 %v965_v13 }
  0x4d   : > { %1305 = vmatpush.msrb.mxu0 %v995_v5  ;;  %1174 = vmatpush.msrb.mxu1 %v964_v15 }
  0x4e   : > { %565 = vmatmul.f32.gmra.mxu0 %v505_v22  ;;  %2072 = vmatpush.msrb.mxu2 %v964_v15 }
  0x4f   : > { %1175 = vmatpush.msrb.mxu1 %v963_v16  ;;  %663 = vmatmul.f32.vlgmr.msra.gmra.mxu2 %v645_v62 }
  0x50   : > { %2073 = vmatpush.msrb.mxu2 %v963_v16 }
  0x51   : > { %1420 = vmatpush.msra.mxu1 %v1042_v9  ;;  %v1027_v9 = vld [vmem:[%s3746_s4 + $0x280] sm:$0xff] }
  0x53   : > { %1421 = vmatpush.msra.mxu1 %v1041_v12 }
  0x56   : > { %568 = vmatmul.f32.gmra.mxu0 %v506_v23  ;;  %v675_v23 = vstv %s674_s17  ;;  %s3679_s17 = scalar_lea.vmem %s3751_s9, %s1984_s25 }
  0x57   : > { %666 = vmatmul.f32.gmra.mxu2 %v646_v6  ;;  %v989_v6 = vld [vmem:[%s3746_s4 + $0x150] sm:$0xff] }
  0x5e   : > { %571 = vmatmul.f32.gmra.mxu0 %v507_v24 }
  0x66   : > { %574 = vmatmul.f32.gmra.mxu0 %v508_v25 }
  0x6e   : > { %577 = vmatmul.f32.gmra.mxu0 %v509_v26 }
  0x76   : > { %580 = vmatmul.f32.gmra.mxu0 %v510_v29 }
  0x7e   : > { %583 = vmatmul.f32.gmra.mxu0 %v511_v38 }
  0x86   : > { %586 = vmatmul.f32.gmra.mxu0 %v512_v50 }
  0x8e   : > { %589 = vmatmul.f32.gmra.mxu0 %v513_v60 }
  0x96   : > { %592 = vmatmul.f32.gmra.mxu0 %v514_v8 }
  0x9e   : > { %595 = vmatmul.f32.gmra.mxu0 %v515_v14  ;;  %v1040_v14 = vld [vmem:[%s3746_s4 + $0x2e8] sm:$0xff] }
  0x9f   : > { %1422 = vmatpush.msra.mxu1 %v1040_v14  ;;  %v2762_v14 = vld [vmem:[%s3746_s4 + $0x3f8] sm:$0xff] }
  0xa0   : > { %1550 = vmatpush.msra.mxu0 %v2762_v14 }
  0xa6   : > { %598 = vmatmul.f32.gmra.mxu0 %v516_v17  ;;  %v1039_v17 = vld [vmem:[%s3746_s4 + $0x2e0] sm:$0xff] }
  0xa7   : > { %1423 = vmatpush.msra.mxu1 %v1039_v17  ;;  %v1026_v17 = vld [vmem:[%s3746_s4 + $0x278] sm:$0xff] }
  0xa8   : > { %1355 = vmatpush.msrb.mxu3 %v1026_v17  ;;  %v982_v17 = vld [vmem:[%s3746_s4 + $0x118] sm:$0xff] }
  0xab   : > { %v554_v19 = vpop.f32.mrf.mxu0  ;;  %v637_v20 = vpop.f32.mrf.mxu1 }
  0xac   : > { %v555_v21 = vadd.f32 %v2534_v18, %v554_v19  ;;  %v638_v22 = vadd.f32 %v2534_v18, %v637_v20  ;;  %v1038_v20 = vld [vmem:[%s3746_s4 + $0x2d8] sm:$0xff] }
  0xad   : > { %1424 = vmatpush.msra.mxu1 %v1038_v20 }
  0xae   : > { %v602_v24 = vmax.f32 %v555_v21, 0.0  ;;  %v643_v25 = vmax.f32 %v638_v22, 0.0 }
  0xb0   : > { %v708_v27 = vrot.slane %v602_v24, 7  ;;  %v676_v28 = vmul.f32 %v675_v23, %v643_v25  ;;  %v1037_v25 = vld [vmem:[%s3746_s4 + $0x2d0] sm:$0xff] }
  0xb1   : > { %1425 = vmatpush.msra.mxu1 %v1037_v25  ;;  %v1025_v25 = vld [vmem:[%s3746_s4 + $0x270] sm:$0xff] }
  0xb2   : > { %2023 = vmatmul.msk.f32.vlgmr.msrb.gmra.mxu0 %vm2544_vm1, %v708_v27  ;;  %v705_v29 = vrot.slane %v676_v28, 7  ;;  %v766_v39 = vsel %vm704_vm0, 0.0, %v708_v27  ;;  %1356 = vmatpush.msrb.mxu3 %v1025_v25 }
  0xb3   : > { %v557_v30 = vpop.f32.mrf.mxu0  ;;  %v640_v31 = vpop.f32.mrf.mxu1  ;;  %v864_v49 = vrot.slane %v766_v39, 2  ;;  %v807_v4 = vrot.slane %v766_v39, 1 }
  0xb4   : > { %v558_v32 = vadd.f32 %v2534_v18, %v557_v30  ;;  %v641_v33 = vadd.f32 %v2534_v18, %v640_v31  ;;  %2007 = vmatmul.msk.f32.vlgmr.msra.gmra.mxu3 %vm2544_vm1, %v705_v29  ;;  %v2559_v38 = vsel %vm704_vm0, 0.0, %v705_v29 }
  0xb5   : > { %v802_v45 = vrot.slane %v2559_v38, 1 }
  0xb6   : > { %v603_v34 = vmax.f32 %v558_v32, 0.0  ;;  %v644_v35 = vmax.f32 %v641_v33, 0.0  ;;  %v1035_v32 = vld [vmem:[%s3746_s4 + $0x2c0] sm:$0xff] }
  0xb8   : > { %v709_v36 = vrot.slane %v603_v34, 7  ;;  %v677_v37 = vmul.f32 %v675_v23, %v644_v35  ;;  %v994_v35 = vld [vmem:[%s3746_s4 + $0x178] sm:$0xff] }
  0xb9   : > { %1225 = vmatpush.msra.mxu2 %v994_v35 }
  0xba   : > { %v2563_v40 = vsel %vm704_vm0, %v709_v36, 0.0  ;;  %v706_v41 = vrot.slane %v677_v37, 7  ;;  %v710_v42 = vsel %vm704_vm0, %v708_v27, %v709_v36  ;;  %v993_v36 = vld [vmem:[%s3746_s4 + $0x170] sm:$0xff]  ;;  %v1034_v37 = vld [vmem:[%s3746_s4 + $0x2b8] sm:$0xff] }
  0xbb   : > { %v560_v43 = vpop.f32.mrf.mxu0  ;;  %v865_v44 = vrot.slane %v710_v42, 2  ;;  %1309 = vmatmul.f32.gmra.mxu0 %v710_v42  ;;  %v867_v46 = vrot.slane %v2563_v40, 2  ;;  %v808_v2 = vrot.slane %v710_v42, 1  ;;  %v810_v11 = vrot.slane %v2563_v40, 1  ;;  %1226 = vmatpush.msra.mxu2 %v993_v36 }
  0xbc   : > { %v561_v47 = vadd.f32 %v2534_v18, %v560_v43  ;;  %v2570_v48 = vsel %vm704_vm0, %v705_v29, %v706_v41  ;;  %v2576_v52 = vsel %vm704_vm0, %v706_v41, 0.0  ;;  %v1036_v29 = vld [vmem:[%s3746_s4 + $0x2c8] sm:$0xff]  ;;  %v1033_v41 = vld [vmem:[%s3746_s4 + $0x2b0] sm:$0xff] }
  0xbd   : > { %v803_v50 = vrot.slane %v2570_v48, 1  ;;  %1114 = vmatmul.f32.gmra.mxu3 %v2570_v48  ;;  %v2579_v53 = vsel %vm858_vm2, %v864_v49, %v865_v44  ;;  %v2582_v54 = vsel %vm858_vm2, %v865_v44, %v867_v46  ;;  %v805_v57 = vrot.slane %v2576_v52, 1  ;;  %1426 = vmatpush.msra.mxu1 %v1036_v29  ;;  %v1032_v44 = vld [vmem:[%s3746_s4 + $0x2a8] sm:$0xff] }
  0xbe   : > { %v604_v51 = vmax.f32 %v561_v47, 0.0  ;;  %v2605_v7 = vsel %vm801_vm3, %v807_v4, %v808_v2  ;;  %v2628_v16 = vsel %vm801_vm3, %v808_v2, %v810_v11  ;;  %v1031_v47 = vld [vmem:[%s3746_s4 + $0x2a0] sm:$0xff]  ;;  %v1028_v2 = vld [vmem:[%s3746_s4 + $0x288] sm:$0xff] }
  0xbf   : > { %v804_v55 = vsel %vm801_vm3, %v802_v45, %v803_v50  ;;  %v806_v60 = vsel %vm801_vm3, %v803_v50, %v805_v57  ;;  %1427 = vmatpush.msra.mxu1 %v1035_v32  ;;  %v2808_v32 = vld [vmem:[%s3746_s4 + $0x3e0] sm:$0xff] }
  0xc0   : > { %v2585_v56 = vrot.slane %v604_v51, 7  ;;  %1176 = vmatmul.f32.vlgmr.msrb.gmra.mxu1 %v804_v55  ;;  %v1030_v51 = vld [vmem:[%s3746_s4 + $0x298] sm:$0xff] }
  0xc1   : > { %1428 = vmatpush.msra.mxu1 %v1034_v37 }
  0xc2   : > { %3773 = vst [vmem:[#allocation2_spill] sm:$0xff] %v2585_v56  ;;  %v2646_v22 = vsel %vm704_vm0, 0.0, %v2585_v56 }
  0xc3   : > { %v563_v58 = vpop.f32.mrf.mxu0  ;;  %2025 = vmatmul.msk.f32.gmra.mxu0 %vm2544_vm1, %v2585_v56  ;;  %v812_v28 = vrot.slane %v2646_v22, 1  ;;  %1429 = vmatpush.msra.mxu1 %v1033_v41 }
  0xc4   : > { %v564_v59 = vadd.f32 %v2534_v18, %v563_v58  ;;  %v992_v58 = vld [vmem:[%s3746_s4 + $0x168] sm:$0xff] }
  0xc5   : > { %2009 = vmatmul.msk.f32.gmra.mxu3 %vm2544_vm1, %v708_v27  ;;  %1430 = vmatpush.msra.mxu1 %v1032_v44  ;;  %v2828_v44 = vld [vmem:[%s3746_s4 + $0x3d8] sm:$0xff] }
  0xc6   : > { %v605_v61 = vmax.f32 %v564_v59, 0.0  ;;  %v991_v59 = vld [vmem:[%s3746_s4 + $0x160] sm:$0xff]  ;;  %1227 = vmatpush.msra.mxu2 %v992_v58  ;;  %v985_v58 = vld [vmem:[%s3746_s4 + $0x130] sm:$0xff] }
  0xc7   : > { %1431 = vmatpush.msra.mxu1 %v1031_v47 }
  0xc8   : > { %v712_v63 = vrot.slane %v605_v61, 7  ;;  %1179 = vmatmul.f32.gmra.mxu1 %v806_v60  ;;  %v1029_v61 = vld [vmem:[%s3746_s4 + $0x290] sm:$0xff]  ;;  %1228 = vmatpush.msra.mxu2 %v991_v59  ;;  %v1022_v59 = vld [vmem:[%s3746_s4 + $0x258] sm:$0xff] }
  0xc9   : > { %1432 = vmatpush.msra.mxu1 %v1030_v51 }
  0xca   : > { %v2600_v0 = vsel %vm704_vm0, %v2585_v56, %v712_v63  ;;  %v2666_v33 = vsel %vm704_vm0, %v712_v63, 0.0  ;;  %v990_v63 = vld [vmem:[%s3746_s4 + $0x158] sm:$0xff] }
  0xcb   : > { %3774 = vst [vmem:[#allocation3_spill] sm:$0xff] %v2600_v0  ;;  %v566_v1 = vpop.f32.mrf.mxu0  ;;  %1315 = vmatmul.f32.gmra.mxu0 %v2600_v0  ;;  %v813_v24 = vrot.slane %v2600_v0, 1  ;;  %v815_v39 = vrot.slane %v2666_v33, 1  ;;  %1433 = vmatpush.msra.mxu1 %v1029_v61 }
  0xcc   : > { %v567_v3 = vadd.f32 %v2534_v18, %v566_v1  ;;  %1229 = vmatpush.msra.mxu2 %v990_v63 }
  0xcd   : > { %1120 = vmatmul.f32.gmra.mxu3 %v710_v42  ;;  %v2660_v31 = vsel %vm801_vm3, %v812_v28, %v813_v24  ;;  %v2695_v45 = vsel %vm801_vm3, %v813_v24, %v815_v39  ;;  %1434 = vmatpush.msra.mxu1 %v1028_v2  ;;  %v1021_v2 = vld [vmem:[%s3746_s4 + $0x250] sm:$0xff] }
  0xce   : > { %v606_v5 = vmax.f32 %v567_v3, 0.0  ;;  %1230 = vmatpush.msra.mxu2 %v989_v6 }
  0xcf   : > { %1435 = vmatpush.msra.mxu1 %v1027_v9  ;;  %v1020_v9 = vld [vmem:[%s3746_s4 + $0x248] sm:$0xff] }
  0xd0   : > { %v2607_v8 = vrot.slane %v606_v5, 7  ;;  %1182 = vmatmul.f32.gmra.mxu1 %v2605_v7 }
  0xd2   : > { %3775 = vst [vmem:[#allocation4_spill] sm:$0xff] %v2607_v8  ;;  %v2710_v50 = vsel %vm704_vm0, 0.0, %v2607_v8 }
  0xd3   : > { %v569_v10 = vpop.f32.mrf.mxu0  ;;  %2027 = vmatmul.msk.f32.gmra.mxu0 %vm2544_vm1, %v2607_v8  ;;  %v817_v62 = vrot.slane %v2710_v50, 1 }
  0xd4   : > { %v570_v13 = vadd.f32 %v2534_v18, %v569_v10  ;;  %v988_v10 = vld [vmem:[%s3746_s4 + $0x148] sm:$0xff] }
  0xd5   : > { %2011 = vmatmul.msk.f32.gmra.mxu3 %vm2544_vm1, %v2585_v56  ;;  %1231 = vmatpush.msra.mxu2 %v988_v10  ;;  %v983_v10 = vld [vmem:[%s3746_s4 + $0x120] sm:$0xff]  ;;  %v1056_v56 = vld [vmem:[%s3746_s4 + $0x368] sm:$0xff] }
  0xd6   : > { %v607_v15 = vmax.f32 %v570_v13, 0.0 }
  0xd8   : > { %v2633_v19 = vrot.slane %v607_v15, 7  ;;  %1185 = vmatmul.f32.gmra.mxu1 %v2628_v16 }
  0xda   : > { %v2642_v21 = vsel %vm704_vm0, %v2607_v8, %v2633_v19  ;;  %v2740_v4 = vsel %vm704_vm0, %v2633_v19, 0.0  ;;  %v2774_v19 = vld [vmem:[%s3746_s4 + $0x3f0] sm:$0xff] }
  0xdb   : > { %v572_v23 = vpop.f32.mrf.mxu0  ;;  %1321 = vmatmul.f32.gmra.mxu0 %v2642_v21  ;;  %v818_v57 = vrot.slane %v2642_v21, 1  ;;  %v820_v11 = vrot.slane %v2740_v4, 1 }
  0xdc   : > { %v573_v27 = vadd.f32 %v2534_v18, %v572_v23  ;;  %1551 = vmatpush.msra.mxu0 %v2774_v19 }
  0xdd   : > { %1126 = vmatmul.f32.gmra.mxu3 %v2600_v0  ;;  %v2736_v3 = vsel %vm801_vm3, %v817_v62, %v818_v57  ;;  %v2777_v20 = vsel %vm801_vm3, %v818_v57, %v820_v11 }
  0xde   : > { %v608_v30 = vmax.f32 %v573_v27, 0.0  ;;  %v2791_v27 = vld [vmem:[%s3746_s4 + $0x3e8] sm:$0xff] }
  0xdf   : > { %1552 = vmatpush.msra.mxu0 %v2791_v27 }
  0xe0   : > { %v2668_v34 = vrot.slane %v608_v30, 7  ;;  %1188 = vmatmul.f32.gmra.mxu1 %v2660_v31  ;;  %v1024_v30 = vld [vmem:[%s3746_s4 + $0x268] sm:$0xff] }
  0xe1   : > { %1357 = vmatpush.msrb.mxu3 %v1024_v30  ;;  %1553 = vmatpush.msra.mxu0 %v2808_v32  ;;  %v2906_v30 = vld [vmem:[%s3746_s4 + $0x3b8] sm:$0xff] }
  0xe2   : > { %3776 = vst [vmem:[#allocation5_spill] sm:$0xff] %v2668_v34  ;;  %v2800_v29 = vsel %vm704_vm0, 0.0, %v2668_v34 }
  0xe3   : > { %v575_v40 = vpop.f32.mrf.mxu0  ;;  %2029 = vmatmul.msk.f32.gmra.mxu0 %vm2544_vm1, %v2668_v34  ;;  %v822_v51 = vrot.slane %v2800_v29, 1 }
  0xe4   : > { %v576_v42 = vadd.f32 %v2534_v18, %v575_v40  ;;  %v987_v40 = vld [vmem:[%s3746_s4 + $0x140] sm:$0xff]  ;;  %1554 = vmatpush.msra.mxu0 %v2828_v44 }
  0xe5   : > { %2013 = vmatmul.msk.f32.gmra.mxu3 %vm2544_vm1, %v2607_v8  ;;  %1232 = vmatpush.msra.mxu2 %v987_v40 }
  0xe6   : > { %v609_v43 = vmax.f32 %v576_v42, 0.0  ;;  %v986_v42 = vld [vmem:[%s3746_s4 + $0x138] sm:$0xff] }
  0xe7   : > { %1233 = vmatpush.msra.mxu2 %v986_v42 }
  0xe8   : > { %v2697_v46 = vrot.slane %v609_v43, 7  ;;  %1191 = vmatmul.f32.gmra.mxu1 %v2695_v45  ;;  %v1023_v43 = vld [vmem:[%s3746_s4 + $0x260] sm:$0xff] }
  0xe9   : > { %1358 = vmatpush.msrb.mxu3 %v1023_v43  ;;  %1234 = vmatpush.msra.mxu2 %v985_v58  ;;  %v981_v43 = vld [vmem:[%s3746_s4 + $0x110] sm:$0xff] }
  0xea   : > { %v2706_v49 = vsel %vm704_vm0, %v2668_v34, %v2697_v46  ;;  %v2856_v62 = vsel %vm704_vm0, %v2697_v46, 0.0  ;;  %v2872_v46 = vld [vmem:[%s3746_s4 + $0x3c8] sm:$0xff] }
  0xeb   : > { %v578_v55 = vpop.f32.mrf.mxu0  ;;  %1327 = vmatmul.f32.gmra.mxu0 %v2706_v49  ;;  %v823_v39 = vrot.slane %v2706_v49, 1  ;;  %1359 = vmatpush.msrb.mxu3 %v1022_v59  ;;  %v825_v11 = vrot.slane %v2856_v62, 1 }
  0xec   : > { %v579_v60 = vadd.f32 %v2534_v18, %v578_v55 }
  0xed   : > { %1132 = vmatmul.f32.gmra.mxu3 %v2642_v21  ;;  %v2851_v61 = vsel %vm801_vm3, %v822_v51, %v823_v39  ;;  %v2914_v40 = vsel %vm801_vm3, %v823_v39, %v825_v11  ;;  %v1017_v39 = vld [vmem:[%s3746_s4 + $0x230] sm:$0xff]  ;;  %v2936_v51 = vld [vmem:[%s3746_s4 + $0x3a8] sm:$0xff]  ;;  %v979_v11 = vld [vmem:[%s3746_s4 + $0x100] sm:$0xff] }
  0xee   : > { %v610_v1 = vmax.f32 %v579_v60, 0.0  ;;  %v2848_v60 = vld [vmem:[%s3746_s4 + $0x3d0] sm:$0xff]  ;;  %1360 = vmatpush.msrb.mxu3 %v1021_v2  ;;  %v980_v2 = vld [vmem:[%s3746_s4 + $0x108] sm:$0xff] }
  0xef   : > { %1555 = vmatpush.msra.mxu0 %v2848_v60 }
  0xf0   : > { %v2742_v5 = vrot.slane %v610_v1, 7  ;;  %1194 = vmatmul.f32.gmra.mxu1 %v2736_v3  ;;  %v984_v1 = vld [vmem:[%s3746_s4 + $0x128] sm:$0xff]  ;;  %1361 = vmatpush.msrb.mxu3 %v1020_v9 }
  0xf1   : > { %1235 = vmatpush.msra.mxu2 %v984_v1  ;;  %1556 = vmatpush.msra.mxu0 %v2872_v46 }
  0xf2   : > { %3777 = vst [vmem:[#allocation6_spill] sm:$0xff] %v2742_v5  ;;  %v2783_v24 = vsel %vm704_vm0, 0.0, %v2742_v5 }
  0xf3   : > { %v581_v12 = vpop.f32.mrf.mxu0  ;;  %2031 = vmatmul.msk.f32.gmra.mxu0 %vm2544_vm1, %v2742_v5  ;;  %v827_v36 = vrot.slane %v2783_v24, 1  ;;  %1236 = vmatpush.msra.mxu2 %v983_v10  ;;  %v2957_v10 = vld [vmem:[%s3746_s4 + $0x3a0] sm:$0xff] }
  0xf4   : > { %v582_v13 = vadd.f32 %v2534_v18, %v581_v12 }
  0xf5   : > { %2015 = vmatmul.msk.f32.gmra.mxu3 %vm2544_vm1, %v2668_v34  ;;  %1237 = vmatpush.msra.mxu2 %v982_v17 }
  0xf6   : > { %v611_v15 = vmax.f32 %v582_v13, 0.0  ;;  %v2887_v13 = vld [vmem:[%s3746_s4 + $0x3c0] sm:$0xff] }
  0xf7   : > { %1557 = vmatpush.msra.mxu0 %v2887_v13  ;;  %1238 = vmatpush.msra.mxu2 %v981_v43 }
  0xf8   : > { %v721_v23 = vrot.slane %v611_v15, 7  ;;  %1197 = vmatmul.f32.gmra.mxu1 %v2777_v20 }
  0xf9   : > { %1558 = vmatpush.msra.mxu0 %v2906_v30  ;;  %1239 = vmatpush.msra.mxu2 %v980_v2 }
  0xfa   : > { %v2796_v28 = vsel %vm704_vm0, %v2742_v5, %v721_v23  ;;  %v2836_v55 = vsel %vm704_vm0, %v721_v23, 0.0  ;;  %v1019_v23 = vld [vmem:[%s3746_s4 + $0x240] sm:$0xff] }
  0xfb   : > { %3778 = vst [vmem:[#allocation7_spill] sm:$0xff] %v2796_v28  ;;  %v584_v35 = vpop.f32.mrf.mxu0  ;;  %1333 = vmatmul.f32.gmra.mxu0 %v2796_v28  ;;  %v828_v37 = vrot.slane %v2796_v28, 1  ;;  %v830_v6 = vrot.slane %v2836_v55, 1  ;;  %1362 = vmatpush.msrb.mxu3 %v1019_v23 }
  0xfc   : > { %v585_v41 = vadd.f32 %v2534_v18, %v584_v35  ;;  %1240 = vmatpush.msra.mxu2 %v979_v11  ;;  %v1012_v11 = vld [vmem:[%s3746_s4 + $0x208] sm:$0xff] }
  0xfd   : > { %1138 = vmatmul.f32.gmra.mxu3 %v2706_v49  ;;  %v2832_v47 = vsel %vm801_vm3, %v827_v36, %v828_v37  ;;  %v2901_v25 = vsel %vm801_vm3, %v828_v37, %v830_v6  ;;  %v1018_v36 = vld [vmem:[%s3746_s4 + $0x238] sm:$0xff]  ;;  %v2919_v37 = vld [vmem:[%s3746_s4 + $0x3b0] sm:$0xff]  ;;  %v1016_v6 = vld [vmem:[%s3746_s4 + $0x228] sm:$0xff] }
  0xfe   : > { %v612_v57 = vmax.f32 %v585_v41, 0.0  ;;  %1206 = vmatmul.f32.vlgmr.msrb.gmra.mxu2 %v2832_v47  ;;  %1363 = vmatpush.msrb.mxu3 %v1018_v36  ;;  %v1058_v36 = vld [vmem:[%s3746_s4 + $0x378] sm:$0xff] }
  0xff   : > { %1559 = vmatpush.msra.mxu0 %v2919_v37  ;;  %1485 = vmatpush.msrb.mxu2 %v1058_v36 }
 0x100   : > { %v2858_v63 = vrot.slane %v612_v57, 7  ;;  %1200 = vmatmul.f32.gmra.mxu1 %v2851_v61  ;;  %1364 = vmatpush.msrb.mxu3 %v1017_v39 }
 0x101   : > { %1560 = vmatpush.msra.mxu0 %v2936_v51 }
 0x102   : > { %3779 = vst [vmem:[#allocation8_spill] sm:$0xff] %v2858_v63  ;;  %v2924_v42 = vsel %vm704_vm0, 0.0, %v2858_v63  ;;  %1365 = vmatpush.msrb.mxu3 %v1016_v6  ;;  %v3004_v6 = vld [vmem:[%s3746_s4 + $0x388] sm:$0xff] }
 0x103   : > { %v587_v12 = vpop.f32.mrf.mxu0  ;;  %2033 = vmatmul.msk.f32.gmra.mxu0 %vm2544_vm1, %v2858_v63  ;;  %v832_v59 = vrot.slane %v2924_v42, 1 }
 0x104   : > { %v588_v15 = vadd.f32 %v2534_v18, %v587_v12  ;;  %1561 = vmatpush.msra.mxu0 %v2957_v10 }
 0x105   : > { %2017 = vmatmul.msk.f32.gmra.mxu3 %vm2544_vm1, %v2742_v5 }
 0x106   : > { %v613_v35 = vmax.f32 %v588_v15, 0.0  ;;  %1209 = vmatmul.f32.gmra.mxu2 %v2901_v25  ;;  %v1015_v15 = vld [vmem:[%s3746_s4 + $0x220] sm:$0xff] }
 0x107   : > { %1366 = vmatpush.msrb.mxu3 %v1015_v15 }
 0x108   : > { %v724_v41 = vrot.slane %v613_v35, 7  ;;  %1203 = vmatmul.f32.gmra.mxu1 %v2914_v40  ;;  %v2976_v35 = vld [vmem:[%s3746_s4 + $0x398] sm:$0xff] }
 0x109   : > { %1562 = vmatpush.msra.mxu0 %v2976_v35 }
 0x10a   : > { %v2940_v57 = vsel %vm704_vm0, %v2858_v63, %v724_v41  ;;  %v2970_v17 = vsel %vm704_vm0, %v724_v41, 0.0  ;;  %v1014_v41 = vld [vmem:[%s3746_s4 + $0x218] sm:$0xff] }
 0x10b   : > { %3780 = vst [vmem:[#allocation9_spill] sm:$0xff] %v2940_v57  ;;  %v590_v58 = vpop.f32.mrf.mxu0  ;;  %1339 = vmatmul.f32.gmra.mxu0 %v2940_v57  ;;  %v833_v1 = vrot.slane %v2940_v57, 1  ;;  %v835_v43 = vrot.slane %v2970_v17, 1  ;;  %1367 = vmatpush.msrb.mxu3 %v1014_v41  ;;  %v1011_v41 = vld [vmem:[%s3746_s4 + $0x200] sm:$0xff] }
 0x10c   : > { %v591_v9 = vadd.f32 %v2534_v18, %v590_v58  ;;  %v2993_v58 = vld [vmem:[%s3746_s4 + $0x390] sm:$0xff] }
 0x10d   : > { %1144 = vmatmul.f32.gmra.mxu3 %v2796_v28  ;;  %v2964_v12 = vsel %vm801_vm3, %v832_v59, %v833_v1  ;;  %v1013_v59 = vld [vmem:[%s3746_s4 + $0x210] sm:$0xff]  ;;  %1563 = vmatpush.msra.mxu0 %v2993_v58  ;;  %v3015_v15 = vsel %vm801_vm3, %v833_v1, %v835_v43 }
 0x10e   : > { %v614_v23 = vmax.f32 %v591_v9, 0.0  ;;  %1212 = vmatmul.f32.gmra.mxu2 %v2964_v12  ;;  %1368 = vmatpush.msrb.mxu3 %v1013_v59  ;;  %v1057_v59 = vld [vmem:[%s3746_s4 + $0x370] sm:$0xff] }
 0x10f   : > { %1564 = vmatpush.msra.mxu0 %v3004_v6  ;;  %1486 = vmatpush.msrb.mxu2 %v1057_v59  ;;  %v870_v59 = vrot.slane %v2600_v0, 2 }
 0x110   : > { %v2985_v39 = vrot.slane %v614_v23, 7  ;;  %1436 = vmatmul.f32.vlgmr.msra.gmra.mxu1 %v2579_v53  ;;  %v3020_v23 = vld [vmem:[%s3746_s4 + $0x380] sm:$0xff]  ;;  %1369 = vmatpush.msrb.mxu3 %v1012_v11 }
 0x111   : > { %3782 = vst [vmem:[#allocation11_spill] sm:$0xff] %v3020_v23  ;;  %1565 = vmatpush.msra.mxu0 %v3020_v23  ;;  %1487 = vmatpush.msrb.mxu2 %v1056_v56 }
 0x112   : > { %3781 = vst [vmem:[#allocation10_spill] sm:$0xff] %v2985_v39  ;;  %v3033_v43 = vsel %vm704_vm0, 0.0, %v2985_v39  ;;  %1370 = vmatpush.msrb.mxu3 %v1011_v41  ;;  %v869_v41 = vrot.slane %v2646_v22, 2 }
 0x113   : > { %v593_v2 = vpop.f32.mrf.mxu0  ;;  %2035 = vmatmul.msk.f32.gmra.mxu0 %vm2544_vm1, %v2985_v39  ;;  %v837_v11 = vrot.slane %v3033_v43, 1 }
 0x114   : > { %v594_v9 = vadd.f32 %v2534_v18, %v593_v2  ;;  %v3058_v0 = vsel %vm858_vm2, %v869_v41, %v870_v59 }
 0x115   : > { %2019 = vmatmul.msk.f32.gmra.mxu3 %vm2544_vm1, %v2858_v63  ;;  %3784 = vst [vmem:[#allocation13_spill] sm:$0xff] %v3058_v0 }
 0x116   : > { %v615_v36 = vmax.f32 %v594_v9, 0.0  ;;  %1215 = vmatmul.f32.gmra.mxu2 %v3015_v15 }
 0x118   : > { %v727_v1 = vrot.slane %v615_v36, 7  ;;  %1439 = vmatmul.f32.gmra.mxu1 %v2582_v54 }
 0x11a   : > { %v3038_v2 = vsel %vm704_vm0, %v2985_v39, %v727_v1  ;;  %v3051_v34 = vsel %vm704_vm0, %v727_v1, 0.0  ;;  %v872_v1 = vrot.slane %v2666_v33, 2  ;;  %v1055_v33 = vld [vmem:[%s3746_s4 + $0x360] sm:$0xff] }
 0x11b   : > { %3783 = vst [vmem:[#allocation12_spill] sm:$0xff] %v3038_v2  ;;  %v596_v9 = vpop.f32.mrf.mxu0  ;;  %1345 = vmatmul.f32.gmra.mxu0 %v3038_v2  ;;  %v838_v36 = vrot.slane %v3038_v2, 1  ;;  %v840_v22 = vrot.slane %v3051_v34, 1  ;;  %1488 = vmatpush.msrb.mxu2 %v1055_v33  ;;  %v1053_v33 = vld [vmem:[%s3746_s4 + $0x350] sm:$0xff] }
 0x11c   : > { %v597_v63 = vadd.f32 %v2534_v18, %v596_v9  ;;  %v3080_v41 = vsel %vm858_vm2, %v870_v59, %v872_v1  ;;  %v874_v1 = vrot.slane %v2710_v50, 2 }
 0x11d   : > { %1150 = vmatmul.f32.gmra.mxu3 %v2940_v57  ;;  %v3047_v5 = vsel %vm801_vm3, %v837_v11, %v838_v36  ;;  %v3073_v56 = vsel %vm801_vm3, %v838_v36, %v840_v22  ;;  %v859_v36 = vrot.slane %v2559_v38, 2  ;;  %v1054_v38 = vld [vmem:[%s3746_s4 + $0x358] sm:$0xff] }
 0x11e   : > { %v616_v8 = vmax.f32 %v597_v63, 0.0  ;;  %1218 = vmatmul.f32.gmra.mxu2 %v3047_v5 }
 0x11f   : > { %1489 = vmatpush.msrb.mxu2 %v1054_v38 }
 0x120   : > { %v3060_v9 = vrot.slane %v616_v8, 7  ;;  %1442 = vmatmul.f32.gmra.mxu1 %v3058_v0 }
 0x121   : > { %1490 = vmatpush.msrb.mxu2 %v1053_v33  ;;  %v1048_v33 = vld [vmem:[%s3746_s4 + $0x328] sm:$0xff] }
 0x122   : > { %3785 = vst [vmem:[#allocation14_spill] sm:$0xff] %v3060_v9 }
 0x123   : > { %v599_v11 = vpop.f32.mrf.mxu0  ;;  %2037 = vmatmul.msk.f32.gmra.mxu0 %vm2544_vm1, %v3060_v9 }
 0x124   : > { %v600_v63 = vadd.f32 %v2534_v18, %v599_v11  ;;  %v860_v18 = vrot.slane %v2570_v48, 2  ;;  %v875_v11 = vrot.slane %v2642_v21, 2 }
 0x125   : > { %2021 = vmatmul.msk.f32.gmra.mxu3 %vm2544_vm1, %v2985_v39 }
 0x126   : > { %v617_v8 = vmax.f32 %v600_v63, 0.0  ;;  %1221 = vmatmul.f32.gmra.mxu2 %v3073_v56  ;;  %v861_v59 = vsel %vm858_vm2, %v859_v36, %v860_v18  ;;  %v3101_v48 = vsel %vm858_vm2, %v874_v1, %v875_v11  ;;  %v862_v63 = vrot.slane %v2576_v52, 2 }
 0x127   : > { %v880_v52 = vrot.slane %v2706_v49, 2  ;;  %v882_v1 = vrot.slane %v2856_v62, 2  ;;  %v885_v62 = vrot.slane %v2796_v28, 2  ;;  %v3321_v28 = vld [vmem:[%s3746_s4 + $0x428] sm:$0xff] }
 0x128   : > { %v3082_v23 = vrot.slane %v617_v8, 7  ;;  %1445 = vmatmul.f32.gmra.mxu1 %v3080_v41  ;;  %v877_v8 = vrot.slane %v2740_v4, 2  ;;  %v863_v50 = vsel %vm858_vm2, %v860_v18, %v862_v63  ;;  %v1052_v4 = vld [vmem:[%s3746_s4 + $0x348] sm:$0xff] }
 0x129   : > { %1491 = vmatpush.msrb.mxu2 %v1052_v4  ;;  %v892_v4 = vrot.slane %v2970_v17, 2  ;;  %v894_v17 = vrot.slane %v3033_v43, 2  ;;  %v1045_v43 = vld [vmem:[%s3746_s4 + $0x310] sm:$0xff] }
 0x12a   : > { %v3090_v22 = vsel %vm704_vm0, %v3060_v9, %v3082_v23 }
 0x12b   : > { %3786 = vst [vmem:[#allocation15_spill] sm:$0xff] %v3090_v22  ;;  %1351 = vmatmul.f32.gmra.mxu0 %v3090_v22 }
 0x12d   : > { %1156 = vmatmul.f32.gmra.mxu3 %v3038_v2 }
 0x12e   : > { %1241 = vmatmul.f32.vlgmr.msra.gmra.mxu2 %v861_v59  ;;  %v3115_v59 = vsel %vm858_vm2, %v875_v11, %v877_v8  ;;  %v887_v8 = vrot.slane %v2836_v55, 2  ;;  %v890_v55 = vrot.slane %v2940_v57, 2  ;;  %v3314_v57 = vld [vmem:[%s3746_s4 + $0x430] sm:$0xff] }
 0x130   : > { %1448 = vmatmul.f32.gmra.mxu1 %v3101_v48 }
 0x133   : > { %1566 = vmatmul.f32.vlgmr.msra.gmra.mxu0 %v2660_v31 }
 0x135   : > { %1371 = vmatmul.f32.vlgmr.msrb.gmra.mxu3 %v2605_v7  ;;  %v879_v7 = vrot.slane %v2800_v29, 2 }
 0x136   : > { %1244 = vmatmul.f32.gmra.mxu2 %v863_v50 }
 0x137   : > { %v3112_v36 = vpop.f32.mrf.mxu3  ;;  %v3127_v18 = vsel %vm858_vm2, %v879_v7, %v880_v52 }
 0x138   : > { %1451 = vmatmul.f32.gmra.mxu1 %v3115_v59 }
 0x13b   : > { %1569 = vmatmul.f32.gmra.mxu0 %v2695_v45 }
 0x13d   : > { %1374 = vmatmul.f32.gmra.mxu3 %v2628_v16  ;;  %v3140_v16 = vsel %vm858_vm2, %v880_v52, %v882_v1 }
 0x13e   : > { %1247 = vmatmul.f32.gmra.mxu2 %v2579_v53  ;;  %v1051_v53 = vld [vmem:[%s3746_s4 + $0x340] sm:$0xff] }
 0x13f   : > { %1492 = vmatpush.msrb.mxu2 %v1051_v53  ;;  %v3199_v53 = vpop.f32.mrf.mxu0 }
 0x140   : > { %v3129_v11 = vpop.f32.mrf.mxu3  ;;  %1454 = vmatmul.f32.gmra.mxu1 %v3127_v18 }
 0x143   : > { %1572 = vmatmul.f32.gmra.mxu0 %v2736_v3 }
 0x145   : > { %1377 = vmatmul.f32.gmra.mxu3 %v2660_v31  ;;  %v1050_v31 = vld [vmem:[%s3746_s4 + $0x338] sm:$0xff] }
 0x146   : > { %1250 = vmatmul.f32.gmra.mxu2 %v2582_v54  ;;  %v884_v54 = vrot.slane %v2783_v24, 2  ;;  %v3167_v24 = vsel %vm858_vm2, %v885_v62, %v887_v8 }
 0x147   : > { %1493 = vmatpush.msrb.mxu2 %v1050_v31  ;;  %3788 = vst [vmem:[#allocation17_spill] sm:$0xff] %v3167_v24 }
 0x148   : > { %v3142_v29 = vpop.f32.mrf.mxu3  ;;  %1457 = vmatmul.f32.gmra.mxu1 %v3140_v16  ;;  %v3154_v38 = vsel %vm858_vm2, %v884_v54, %v885_v62  ;;  %v1046_v62 = vld [vmem:[%s3746_s4 + $0x318] sm:$0xff]  ;;  %v3209_v54 = vpop.f32.mrf.mxu2 }
 0x149   : > { %3787 = vst [vmem:[#allocation16_spill] sm:$0xff] %v3154_v38 }
 0x14a   : > { %3791 = vst [vmem:[#allocation20_spill] sm:$0xff] %v3209_v54  ;;  %v3306_v54 = vld [vmem:[%s3749_s7] ss:$0 sm:$0xff] }
 0x14b   : > { %1575 = vmatmul.f32.gmra.mxu0 %v2777_v20 }
 0x14d   : > { %1380 = vmatmul.f32.gmra.mxu3 %v2695_v45  ;;  %v1049_v45 = vld [vmem:[%s3746_s4 + $0x330] sm:$0xff] }
 0x14e   : > { %1253 = vmatmul.f32.gmra.mxu2 %v3058_v0  ;;  %v3282_v0 = vld [vmem:[%s3746_s4 + $0x448] sm:$0xff] }
 0x14f   : > { %1494 = vmatpush.msrb.mxu2 %v1049_v45  ;;  %v3218_v45 = vpop.f32.mrf.mxu0 }
 0x150   : > { %v3156_v63 = vpop.f32.mrf.mxu3  ;;  %1460 = vmatmul.f32.gmra.mxu1 %v3154_v38 }
 0x151   : > { %1495 = vmatpush.msrb.mxu2 %v1048_v33  ;;  %v3243_v33 = vpop.f32.mrf.mxu2 }
 0x152   : > { %3794 = vst [vmem:[#allocation23_spill] sm:$0xff] %v3243_v33  ;;  %v3301_v33 = vld [vmem:[%s3746_s4 + $0x438] sm:$0xff] }
 0x153   : > { %1578 = vmatmul.f32.gmra.mxu0 %v2851_v61 }
 0x155   : > { %1383 = vmatmul.f32.gmra.mxu3 %v2736_v3  ;;  %v889_v3 = vrot.slane %v2924_v42, 2  ;;  %v3194_v42 = vsel %vm858_vm2, %v890_v55, %v892_v4  ;;  %v3249_v4 = vld [vmem:[%s3746_s4 + $0x468] sm:$0xff] }
 0x156   : > { %1256 = vmatmul.f32.gmra.mxu2 %v3080_v41 }
 0x157   : > { %v3181_v52 = vsel %vm858_vm2, %v889_v3, %v890_v55  ;;  %v3229_v55 = vld [vmem:[%s3746_s4 + $0x478] sm:$0xff] }
 0x158   : > { %v3169_v50 = vpop.f32.mrf.mxu3  ;;  %1463 = vmatmul.f32.gmra.mxu1 %v3167_v24  ;;  %3789 = vst [vmem:[#allocation18_spill] sm:$0xff] %v3181_v52  ;;  %2090 = vmatpush.msra.mxu3 %v3229_v55 }
 0x15b   : > { %1581 = vmatmul.f32.gmra.mxu0 %v2914_v40 }
 0x15d   : > { %1386 = vmatmul.f32.gmra.mxu3 %v2777_v20  ;;  %v1047_v20 = vld [vmem:[%s3746_s4 + $0x320] sm:$0xff] }
 0x15e   : > { %1259 = vmatmul.f32.gmra.mxu2 %v3101_v48 }
 0x15f   : > { %1496 = vmatpush.msrb.mxu2 %v1047_v20  ;;  %v3256_v20 = vld [vmem:[%s3746_s4 + $0x460] sm:$0xff] }
 0x160   : > { %v3183_v7 = vpop.f32.mrf.mxu3  ;;  %1466 = vmatmul.f32.gmra.mxu1 %v3181_v52 }
 0x161   : > { %1497 = vmatpush.msrb.mxu2 %v1046_v62  ;;  %v3269_v62 = vld [vmem:[%s3746_s4 + $0x458] sm:$0xff] }
 0x163   : > { %1584 = vmatmul.f32.gmra.mxu0 %v2832_v47  ;;  %1498 = vmatpush.msrb.mxu2 %v1045_v43 }
 0x165   : > { %1389 = vmatmul.f32.gmra.mxu3 %v2851_v61  ;;  %v895_v61 = vrot.slane %v3038_v2, 2  ;;  %v1043_v2 = vld [vmem:[%s3746_s4 + $0x300] sm:$0xff] }
 0x166   : > { %1262 = vmatmul.f32.gmra.mxu2 %v3115_v59 }
 0x167   : > { %v3212_v31 = vsel %vm858_vm2, %v894_v17, %v895_v61  ;;  %v1044_v17 = vld [vmem:[%s3746_s4 + $0x308] sm:$0xff] }
 0x168   : > { %v3196_v1 = vpop.f32.mrf.mxu3  ;;  %1469 = vmatmul.f32.gmra.mxu1 %v3194_v42  ;;  %1499 = vmatpush.msrb.mxu2 %v1044_v17  ;;  %v3289_v17 = vld [vmem:[%s3746_s4 + $0x440] sm:$0xff] }
 0x169   : > { %3790 = vst [vmem:[#allocation19_spill] sm:$0xff] %v3196_v1 }
 0x16a   : > { %1500 = vmatpush.msrb.mxu2 %v1043_v2  ;;  %v773_v2 = vsel %vm704_vm0, 0.0, %v3060_v9  ;;  %v3338_v9 = vpop.f32.mrf.mxu1 }
 0x16b   : > { %1587 = vmatmul.f32.gmra.mxu0 %v2901_v25  ;;  %v917_v1 = vrot.slane %v773_v2, 1 }
 0x16c   : > { %2074 = vmatpush.msra.mxu2 %v2762_v14  ;;  %v3331_v14 = vld [vmem:[%s3746_s4 + $0x420] sm:$0xff] }
 0x16d   : > { %1392 = vmatmul.f32.gmra.mxu3 %v2914_v40  ;;  %v897_v40 = vrot.slane %v3051_v34, 2 }
 0x16e   : > { %1265 = vmatmul.f32.gmra.mxu2 %v3127_v18 }
 0x16f   : > { %v3232_v3 = vsel %vm858_vm2, %v895_v61, %v897_v40  ;;  %v3258_v61 = vpop.f32.mrf.mxu0  ;;  %2075 = vmatpush.msra.mxu2 %v2774_v19 }
 0x170   : > { %v3214_v8 = vpop.f32.mrf.mxu3  ;;  %1472 = vmatmul.f32.gmra.mxu1 %v3212_v31 }
 0x171   : > { %3792 = vst [vmem:[#allocation21_spill] sm:$0xff] %v3214_v8  ;;  %v925_v8 = vrot.slane %v3090_v22, 2  ;;  %2076 = vmatpush.msra.mxu2 %v2791_v27  ;;  %v783_v27 = vsel %vm704_vm0, %v3082_v23, 0.0  ;;  %v3371_v23 = vld [vmem:[%s3746_s4 + $0x408] sm:$0xff] }
 0x173   : > { %1590 = vmatmul.f32.gmra.mxu0 %v2964_v12  ;;  %2077 = vmatpush.msra.mxu2 %v2808_v32 }
 0x175   : > { %1395 = vmatmul.f32.gmra.mxu3 %v2832_v47  ;;  %v3241_v47 = vld [vmem:[%s3746_s4 + $0x470] sm:$0xff]  ;;  %2078 = vmatpush.msra.mxu2 %v2828_v44 }
 0x176   : > { %1268 = vmatmul.f32.gmra.mxu2 %v3140_v16  ;;  %2091 = vmatpush.msra.mxu3 %v3241_v47 }
 0x177   : > { %v3308_v39 = vpop.f32.mrf.mxu0  ;;  %2079 = vmatpush.msra.mxu2 %v2848_v60 }
 0x178   : > { %v3235_v34 = vpop.f32.mrf.mxu3  ;;  %1475 = vmatmul.f32.gmra.mxu1 %v3232_v3  ;;  %2092 = vmatpush.msra.mxu3 %v3249_v4 }
 0x179   : > { %3793 = vst [vmem:[#allocation22_spill] sm:$0xff] %v3235_v34  ;;  %2080 = vmatpush.msra.mxu2 %v2872_v46 }
 0x17a   : > { %2093 = vmatpush.msra.mxu3 %v3256_v20 }
 0x17b   : > { %1593 = vmatmul.f32.gmra.mxu0 %v3015_v15  ;;  %2081 = vmatpush.msra.mxu2 %v2887_v13 }
 0x17c   : > { %2094 = vmatpush.msra.mxu3 %v3269_v62 }
 0x17d   : > { %1398 = vmatmul.f32.gmra.mxu3 %v2901_v25  ;;  %v3277_v25 = vld [vmem:[%s3746_s4 + $0x450] sm:$0xff]  ;;  %2082 = vmatpush.msra.mxu2 %v2906_v30 }
 0x17e   : > { %1271 = vmatmul.f32.gmra.mxu2 %v3154_v38  ;;  %2095 = vmatpush.msra.mxu3 %v3277_v25  ;;  %v918_v38 = vrot.slane %v3090_v22, 1 }
 0x17f   : > { %2083 = vmatpush.msra.mxu2 %v2919_v37 }
 0x180   : > { %v3271_v40 = vpop.f32.mrf.mxu3  ;;  %2096 = vmatpush.msra.mxu3 %v3282_v0  ;;  %v919_v32 = vsel %vm801_vm3, %v917_v1, %v918_v38  ;;  %v920_v1 = vrot.slane %v783_v27, 1 }
 0x181   : > { %3795 = vst [vmem:[#allocation24_spill] sm:$0xff] %v3271_v40  ;;  %v1207_v43 = vpop.f32.mrf.mxu2  ;;  %2084 = vmatpush.msra.mxu2 %v2936_v51  ;;  %v3798_v51 = vld [vmem:[#allocation11_spill] sm:$0xff] }
 0x182   : > { %2097 = vmatpush.msra.mxu3 %v3289_v17 }
 0x183   : > { %1596 = vmatmul.f32.gmra.mxu0 %v3047_v5  ;;  %2085 = vmatpush.msra.mxu2 %v2957_v10 }
 0x184   : > { %2098 = vmatpush.msra.mxu3 %v3301_v33 }
 0x185   : > { %1401 = vmatmul.f32.gmra.mxu3 %v2964_v12  ;;  %2086 = vmatpush.msra.mxu2 %v2976_v35  ;;  %v1113_v35 = vadd.f32 %v3306_v54, %v3112_v36 }
 0x186   : > { %1274 = vmatmul.f32.gmra.mxu2 %v3167_v24  ;;  %2099 = vmatpush.msra.mxu3 %v3314_v57 }
 0x187   : > { %2087 = vmatpush.msra.mxu2 %v2993_v58  ;;  %v3799_v58 = vld [vmem:[#allocation2_spill] sm:$0xff] }
 0x188   : > { %v1142_v12 = vpop.f32.mrf.mxu3  ;;  %2100 = vmatpush.msra.mxu3 %v3321_v28 }
 0x189   : > { %v1143_v40 = vadd.f32 %v3306_v54, %v1142_v12  ;;  %v1210_v34 = vpop.f32.mrf.mxu2  ;;  %v924_v12 = vrot.slane %v773_v2, 2  ;;  %v927_v2 = vrot.slane %v783_v27, 2  ;;  %2088 = vmatpush.msra.mxu2 %v3004_v6  ;;  %v1178_v6 = vadd.f32 %v3338_v9, %v1113_v35 }
 0x18a   : > { %2101 = vmatpush.msra.mxu3 %v3331_v14 }
 0x18b   : > { %1599 = vmatmul.f32.gmra.mxu0 %v3073_v56  ;;  %v3334_v24 = vadd.f32 %v1207_v43, %v1143_v40  ;;  %v3342_v19 = vsel %vm858_vm2, %v924_v12, %v925_v8  ;;  %v3350_v40 = vld [vmem:[%s3746_s4 + $0x418] sm:$0xff]  ;;  %v3360_v43 = vld [vmem:[%s3746_s4 + $0x410] sm:$0xff]  ;;  %v3362_v12 = vpop.f32.mrf.mxu0  ;;  %v3384_v44 = vsel %vm858_vm2, %v925_v8, %v927_v2  ;;  %2089 = vmatpush.msra.mxu2 %v3798_v51 }
 0x18c   : > { %3797 = vst [vmem:[#allocation26_spill] sm:$0xff] %v3342_v19  ;;  %1478 = vmatmul.f32.gmra.mxu1 %v3342_v19  ;;  %2102 = vmatpush.msra.mxu3 %v3350_v40  ;;  %v3376_v19 = vld [vmem:[%s3746_s4 + $0x400] sm:$0xff] }
 0x18d   : > { %3796 = vst [vmem:[#allocation25_spill] sm:$0xff] %v3334_v24  ;;  %1404 = vmatmul.f32.gmra.mxu3 %v3015_v15 }
 0x18e   : > { %1277 = vmatmul.f32.gmra.mxu2 %v3181_v52  ;;  %2103 = vmatpush.msra.mxu3 %v3360_v43  ;;  %v1180_v52 = vpop.f32.mrf.mxu1 }
 0x190   : > { %v1145_v15 = vpop.f32.mrf.mxu3  ;;  %2104 = vmatpush.msra.mxu3 %v3371_v23 }
 0x191   : > { %v1146_v22 = vadd.f32 %v3306_v54, %v1145_v15  ;;  %v1213_v24 = vpop.f32.mrf.mxu2 }
 0x192   : > { %2105 = vmatpush.msra.mxu3 %v3376_v19 }
 0x193   : > { %v3379_v15 = vadd.f32 %v1210_v34, %v1146_v22  ;;  %1602 = vmatmul.f32.gmra.mxu0 %v919_v32  ;;  %v3394_v8 = vpop.f32.mrf.mxu0 }
 0x194   : > { %1481 = vmatmul.f32.gmra.mxu1 %v3384_v44 }
 0x195   : > { %1407 = vmatmul.f32.gmra.mxu3 %v3047_v5  ;;  %v921_v5 = vsel %vm801_vm3, %v918_v38, %v920_v1 }
 0x196   : > { %1280 = vmatmul.f32.gmra.mxu2 %v3194_v42  ;;  %v1183_v2 = vpop.f32.mrf.mxu1 }
 0x198   : > { %v1148_v60 = vpop.f32.mrf.mxu3 }
 0x199   : > { %v1149_v22 = vadd.f32 %v3306_v54, %v1148_v60  ;;  %v1216_v34 = vpop.f32.mrf.mxu2 }
 0x19b   : > { %v3397_v46 = vadd.f32 %v1213_v24, %v1149_v22  ;;  %1605 = vmatmul.f32.gmra.mxu0 %v921_v5 }
 0x19d   : > { %1410 = vmatmul.f32.gmra.mxu3 %v3073_v56 }
 0x19e   : > { %1283 = vmatmul.f32.gmra.mxu2 %v3212_v31 }
 0x1a0   : > { %v1151_v13 = vpop.f32.mrf.mxu3 }
 0x1a1   : > { %v1152_v30 = vadd.f32 %v3306_v54, %v1151_v13  ;;  %v1219_v27 = vpop.f32.mrf.mxu2  ;;  %v1186_v13 = vpop.f32.mrf.mxu1 }
 0x1a3   : > { %v3406_v37 = vadd.f32 %v1216_v34, %v1152_v30  ;;  %v1116_v34 = vadd.f32 %v3306_v54, %v3129_v11  ;;  %v3801_v11 = vld [vmem:[#allocation4_spill] sm:$0xff] }
 0x1a5   : > { %1413 = vmatmul.f32.gmra.mxu3 %v919_v32 }
 0x1a6   : > { %1286 = vmatmul.f32.gmra.mxu2 %v3232_v3 }
 0x1a8   : > { %v1154_v56 = vpop.f32.mrf.mxu3 }
 0x1a9   : > { %v1155_v10 = vadd.f32 %v3306_v54, %v1154_v56  ;;  %v1222_v38 = vpop.f32.mrf.mxu2 }
 0x1ab   : > { %v3412_v24 = vadd.f32 %v1219_v27, %v1155_v10  ;;  %v1325_v10 = vpop.f32.mrf.mxu0 }
 0x1ad   : > { %1416 = vmatmul.f32.gmra.mxu3 %v921_v5  ;;  %v1181_v5 = vadd.f32 %v1180_v52, %v1116_v34 }
 0x1ae   : > { %2039 = vmatmul.msk.f32.vlgmr.msrb.gmra.mxu2 %vm2544_vm1, %v3799_v58 }
 0x1af   : > { %1615 = vmatpush.msrb.mxu2 %v3229_v55  ;;  %v3800_v55 = vld [vmem:[#allocation3_spill] sm:$0xff] }
 0x1b0   : > { %v1157_v32 = vpop.f32.mrf.mxu3 }
 0x1b1   : > { %v1158_v1 = vadd.f32 %v3306_v54, %v1157_v32  ;;  %v1242_v60 = vpop.f32.mrf.mxu2  ;;  %1616 = vmatpush.msrb.mxu2 %v3241_v47  ;;  %v3804_v32 = vld [vmem:[#allocation19_spill] sm:$0xff] }
 0x1b2   : > { %v1243_v22 = vadd.f32 %v1242_v60, %v1178_v6  ;;  %v3803_v6 = vld [vmem:[#allocation16_spill] sm:$0xff]  ;;  %v3805_v60 = vld [vmem:[#allocation6_spill] sm:$0xff] }
 0x1b3   : > { %1617 = vmatpush.msrb.mxu2 %v3249_v4  ;;  %v3424_v36 = vadd.f32 %v1222_v38, %v1158_v1  ;;  %v1131_v1 = vadd.f32 %v3306_v54, %v3804_v32  ;;  %v3815_v32 = vld [vmem:[#allocation25_spill] sm:$0xff] }
 0x1b4   : > { %v1308_v9 = vadd.f32 %v3199_v53, %v1243_v22 }
 0x1b5   : > { %1634 = vmatmul.f32.vlgmr.msra.gmra.mxu3 %v3080_v41  ;;  %1618 = vmatpush.msrb.mxu2 %v3256_v20  ;;  %v1119_v41 = vadd.f32 %v3306_v54, %v3142_v29  ;;  %v1122_v29 = vadd.f32 %v3306_v54, %v3156_v63  ;;  %v3802_v63 = vld [vmem:[#allocation5_spill] sm:$0xff] }
 0x1b6   : > { %1504 = vmatmul.f32.gmra.mxu2 %v3800_v55 }
 0x1b7   : > { %1619 = vmatpush.msrb.mxu2 %v3269_v62  ;;  %v1184_v53 = vadd.f32 %v1183_v2, %v1119_v41 }
 0x1b8   : > { %v1372_v47 = vpop.f32.mrf.mxu3 }
 0x1b9   : > { %v3433_v30 = vadd.f32 %v1372_v47, %v1308_v9  ;;  %v1245_v4 = vpop.f32.mrf.mxu2  ;;  %1620 = vmatpush.msrb.mxu2 %v3277_v25  ;;  %v1189_v25 = vpop.f32.mrf.mxu1  ;;  %v3807_v47 = vld [vmem:[#allocation21_spill] sm:$0xff] }
 0x1ba   : > { %v1246_v27 = vadd.f32 %v1245_v4, %v1181_v5  ;;  %v3806_v5 = vld [vmem:[#allocation17_spill] sm:$0xff]  ;;  %v3808_v4 = vld [vmem:[#allocation7_spill] sm:$0xff] }
 0x1bb   : > { %1621 = vmatpush.msrb.mxu2 %v3282_v0 }
 0x1bc   : > { %v1311_v52 = vadd.f32 %v3218_v45, %v1246_v27 }
 0x1bd   : > { %1637 = vmatmul.f32.gmra.mxu3 %v3101_v48  ;;  %1622 = vmatpush.msrb.mxu2 %v3289_v17 }
 0x1be   : > { %2041 = vmatmul.msk.f32.gmra.mxu2 %vm2544_vm1, %v3801_v11 }
 0x1bf   : > { %1623 = vmatpush.msrb.mxu2 %v3301_v33  ;;  %v1187_v33 = vadd.f32 %v1186_v13, %v1122_v29  ;;  %v1134_v13 = vadd.f32 %v3306_v54, %v3807_v47 }
 0x1c0   : > { %v1375_v20 = vpop.f32.mrf.mxu3 }
 0x1c1   : > { %v3446_v62 = vadd.f32 %v1375_v20, %v1311_v52  ;;  %v1248_v0 = vpop.f32.mrf.mxu2  ;;  %1624 = vmatpush.msrb.mxu2 %v3314_v57 }
 0x1c2   : > { %v1249_v48 = vadd.f32 %v1248_v0, %v1184_v53 }
 0x1c3   : > { %1625 = vmatpush.msrb.mxu2 %v3321_v28 }
 0x1c4   : > { %v1314_v45 = vadd.f32 %v3258_v61, %v1249_v48  ;;  %v3809_v48 = vld [vmem:[#allocation18_spill] sm:$0xff] }
 0x1c5   : > { %1640 = vmatmul.f32.gmra.mxu3 %v3115_v59  ;;  %1626 = vmatpush.msrb.mxu2 %v3331_v14  ;;  %v1192_v59 = vpop.f32.mrf.mxu1 }
 0x1c6   : > { %1510 = vmatmul.f32.gmra.mxu2 %v2642_v21  ;;  %v1125_v21 = vadd.f32 %v3306_v54, %v3169_v50 }
 0x1c7   : > { %1627 = vmatpush.msrb.mxu2 %v3350_v40 }
 0x1c8   : > { %v1378_v17 = vpop.f32.mrf.mxu3  ;;  %v1190_v14 = vadd.f32 %v1189_v25, %v1125_v21  ;;  %v3810_v25 = vld [vmem:[#allocation22_spill] sm:$0xff] }
 0x1c9   : > { %v3457_v57 = vadd.f32 %v1378_v17, %v1314_v45  ;;  %v1251_v51 = vpop.f32.mrf.mxu2  ;;  %1628 = vmatpush.msrb.mxu2 %v3360_v43  ;;  %v1137_v29 = vadd.f32 %v3306_v54, %v3810_v25  ;;  %v3811_v45 = vld [vmem:[#allocation8_spill] sm:$0xff] }
 0x1ca   : > { %v1252_v28 = vadd.f32 %v1251_v51, %v1187_v33 }
 0x1cb   : > { %1629 = vmatpush.msrb.mxu2 %v3371_v23 }
 0x1cc   : > { %v1317_v61 = vadd.f32 %v3308_v39, %v1252_v28 }
 0x1cd   : > { %1643 = vmatmul.f32.gmra.mxu3 %v3127_v18  ;;  %1630 = vmatpush.msrb.mxu2 %v3376_v19  ;;  %v1128_v18 = vadd.f32 %v3306_v54, %v3183_v7  ;;  %v1195_v50 = vpop.f32.mrf.mxu1 }
 0x1ce   : > { %2043 = vmatmul.msk.f32.gmra.mxu2 %vm2544_vm1, %v3802_v63  ;;  %v1196_v7 = vadd.f32 %v1195_v50, %v1131_v1 }
 0x1cf   : > { %v1193_v38 = vadd.f32 %v1192_v59, %v1128_v18 }
 0x1d0   : > { %v1381_v40 = vpop.f32.mrf.mxu3 }
 0x1d1   : > { %v3469_v43 = vadd.f32 %v1381_v40, %v1317_v61  ;;  %v1254_v56 = vpop.f32.mrf.mxu2 }
 0x1d2   : > { %v1255_v23 = vadd.f32 %v1254_v56, %v1190_v14  ;;  %v3812_v14 = vld [vmem:[#allocation24_spill] sm:$0xff]  ;;  %v3813_v56 = vld [vmem:[#allocation9_spill] sm:$0xff] }
 0x1d3   : > { %v1140_v40 = vadd.f32 %v3306_v54, %v3812_v14 }
 0x1d4   : > { %v1320_v19 = vadd.f32 %v3362_v12, %v1255_v23 }
 0x1d5   : > { %1646 = vmatmul.f32.gmra.mxu3 %v3140_v16  ;;  %v1328_v16 = vpop.f32.mrf.mxu0  ;;  %v1198_v22 = vpop.f32.mrf.mxu1 }
 0x1d6   : > { %1516 = vmatmul.f32.gmra.mxu2 %v2706_v49  ;;  %v1199_v11 = vadd.f32 %v1198_v22, %v1134_v13  ;;  %v3818_v22 = vld [vmem:[#allocation12_spill] sm:$0xff] }
 0x1d8   : > { %v1384_v35 = vpop.f32.mrf.mxu3 }
 0x1d9   : > { %v3476_v39 = vadd.f32 %v1384_v35, %v1320_v19  ;;  %v1257_v58 = vpop.f32.mrf.mxu2 }
 0x1da   : > { %v1258_v2 = vadd.f32 %v1257_v58, %v1193_v38  ;;  %v3814_v58 = vld [vmem:[#allocation10_spill] sm:$0xff] }
 0x1dc   : > { %v1323_v49 = vadd.f32 %v3394_v8, %v1258_v2 }
 0x1dd   : > { %1649 = vmatmul.f32.gmra.mxu3 %v3803_v6  ;;  %v1331_v41 = vpop.f32.mrf.mxu0  ;;  %v1201_v0 = vpop.f32.mrf.mxu1 }
 0x1de   : > { %2045 = vmatmul.msk.f32.gmra.mxu2 %vm2544_vm1, %v3805_v60  ;;  %v1202_v17 = vadd.f32 %v1201_v0, %v1137_v29  ;;  %v3816_v60 = vld [vmem:[#allocation20_spill] sm:$0xff] }
 0x1e0   : > { %v1387_v12 = vpop.f32.mrf.mxu3 }
 0x1e1   : > { %v3485_v34 = vadd.f32 %v1387_v12, %v1323_v49  ;;  %v1260_v55 = vpop.f32.mrf.mxu2 }
 0x1e2   : > { %v1261_v9 = vadd.f32 %v1260_v55, %v1196_v7 }
 0x1e4   : > { %v1326_v27 = vadd.f32 %v1325_v10, %v1261_v9 }
 0x1e5   : > { %1652 = vmatmul.f32.gmra.mxu3 %v3806_v5  ;;  %v1334_v21 = vpop.f32.mrf.mxu0  ;;  %v1204_v61 = vpop.f32.mrf.mxu1 }
 0x1e6   : > { %1522 = vmatmul.f32.gmra.mxu2 %v3808_v4  ;;  %v1205_v10 = vadd.f32 %v1204_v61, %v1140_v40 }
 0x1e8   : > { %v1390_v52 = vpop.f32.mrf.mxu3 }
 0x1e9   : > { %v3491_v53 = vadd.f32 %v1390_v52, %v1326_v27  ;;  %v1263_v8 = vpop.f32.mrf.mxu2  ;;  %v681_v27 = vstv %s680_s30 }
 0x1ea   : > { %v1264_v20 = vadd.f32 %v1263_v8, %v1199_v11  ;;  %v3819_v8 = vld [vmem:[#allocation26_spill] sm:$0xff] }
 0x1ec   : > { %v1329_v33 = vadd.f32 %v1328_v16, %v1264_v20  ;;  %v2149_v16 = vld [vmem:[%s3748_s6] ss:$0 sm:$0xff] }
 0x1ed   : > { %1655 = vmatmul.f32.gmra.mxu3 %v3809_v48  ;;  %v1337_v35 = vpop.f32.mrf.mxu0  ;;  %v665_v49 = vadd.f32 %v2149_v16, %v3816_v60  ;;  %v3820_v20 = vld [vmem:[#allocation14_spill] sm:$0xff] }
 0x1ee   : > { %2047 = vmatmul.msk.f32.gmra.mxu2 %vm2544_vm1, %v3811_v45  ;;  %v1437_v45 = vpop.f32.mrf.mxu1 }
 0x1ef   : > { %v670_v5 = vmax.f32 %v665_v49, 0.0 }
 0x1f0   : > { %v1393_v51 = vpop.f32.mrf.mxu3 }
 0x1f1   : > { %v3499_v28 = vadd.f32 %v1393_v51, %v1329_v33  ;;  %v1266_v59 = vpop.f32.mrf.mxu2  ;;  %v682_v11 = vmul.f32 %v681_v27, %v670_v5 }
 0x1f2   : > { %v1267_v63 = vadd.f32 %v1266_v59, %v1202_v17 }
 0x1f3   : > { %v732_v25 = vrot.slane %v682_v11, 7 }
 0x1f4   : > { %v1332_v23 = vadd.f32 %v1331_v41, %v1267_v63 }
 0x1f5   : > { %1658 = vmatmul.f32.gmra.mxu3 %v3194_v42  ;;  %v1340_v12 = vpop.f32.mrf.mxu0  ;;  %v774_v59 = vsel %vm704_vm0, 0.0, %v732_v25 }
 0x1f6   : > { %1528 = vmatmul.f32.gmra.mxu2 %v3813_v56  ;;  %v940_v14 = vrot.slane %v774_v59, 2  ;;  %v933_v49 = vrot.slane %v774_v59, 1 }
 0x1f8   : > { %v1396_v18 = vpop.f32.mrf.mxu3 }
 0x1f9   : > { %v3505_v50 = vadd.f32 %v1396_v18, %v1332_v23  ;;  %v1269_v19 = vpop.f32.mrf.mxu2 }
 0x1fa   : > { %v1270_v38 = vadd.f32 %v1269_v19, %v1205_v10  ;;  %v1440_v19 = vpop.f32.mrf.mxu1 }
 0x1fc   : > { %v1335_v42 = vadd.f32 %v1334_v21, %v1270_v38  ;;  %v3821_v21 = vld [vmem:[#allocation15_spill] sm:$0xff] }
 0x1fd   : > { %1661 = vmatmul.f32.gmra.mxu3 %v3212_v31  ;;  %v3817_v31 = vld [vmem:[#allocation23_spill] sm:$0xff]  ;;  %v1343_v0 = vpop.f32.mrf.mxu0 }
 0x1fe   : > { %2049 = vmatmul.msk.f32.gmra.mxu2 %vm2544_vm1, %v3814_v58  ;;  %v668_v7 = vadd.f32 %v2149_v16, %v3817_v31 }
 0x200   : > { %v1399_v2 = vpop.f32.mrf.mxu3  ;;  %v671_v47 = vmax.f32 %v668_v7, 0.0 }
 0x201   : > { %v3512_v54 = vadd.f32 %v1399_v2, %v1335_v42  ;;  %v1272_v6 = vpop.f32.mrf.mxu2 }
 0x202   : > { %v1273_v1 = vadd.f32 %v1272_v6, %v3815_v32  ;;  %v683_v52 = vmul.f32 %v681_v27, %v671_v47  ;;  %v1443_v16 = vpop.f32.mrf.mxu1  ;;  %v1438_v27 = vadd.f32 %v1437_v45, %v3433_v30  ;;  %v1708_v30 = vld [vmem:[%s3747_s5 + $0x60] sm:$0xff] }
 0x203   : > { %v1444_v45 = vadd.f32 %v1443_v16, %v3457_v57 }
 0x204   : > { %v1338_v55 = vadd.f32 %v1337_v35, %v1273_v1  ;;  %v733_v29 = vrot.slane %v683_v52, 7  ;;  %v1711_v1 = vld [vmem:[%s3747_s5 + $0x78] sm:$0xff] }
 0x205   : > { %1664 = vmatmul.f32.gmra.mxu3 %v3232_v3  ;;  %v1346_v10 = vpop.f32.mrf.mxu0  ;;  %1716 = vmatpush.msrb.mxu1 %v1711_v1  ;;  %v1702_v1 = vld [vmem:[%s3747_s5 + $0x30] sm:$0xff] }
 0x206   : > { %1534 = vmatmul.f32.gmra.mxu2 %v3818_v22  ;;  %v1710_v22 = vld [vmem:[%s3747_s5 + $0x70] sm:$0xff] }
 0x207   : > { %1717 = vmatpush.msrb.mxu1 %v1710_v22 }
 0x208   : > { %v1402_v9 = vpop.f32.mrf.mxu3 }
 0x209   : > { %v3522_v13 = vadd.f32 %v1402_v9, %v1338_v55  ;;  %v1275_v4 = vpop.f32.mrf.mxu2 }
 0x20a   : > { %v1276_v41 = vadd.f32 %v1275_v4, %v3379_v15  ;;  %v734_v15 = vsel %vm704_vm0, %v732_v25, %v733_v29  ;;  %v1446_v5 = vpop.f32.mrf.mxu1 }
 0x20b   : > { %v941_v40 = vrot.slane %v734_v15, 2  ;;  %v1447_v59 = vadd.f32 %v1446_v5, %v3469_v43  ;;  %v1699_v5 = vld [vmem:[%s3747_s5 + $0x18] sm:$0xff] }
 0x20c   : > { %v1341_v3 = vadd.f32 %v1340_v12, %v1276_v41  ;;  %v934_v12 = vrot.slane %v734_v15, 1 }
 0x20d   : > { %1667 = vmatmul.f32.gmra.mxu3 %v3819_v8  ;;  %v1349_v32 = vpop.f32.mrf.mxu0 }
 0x20e   : > { %2051 = vmatmul.msk.f32.gmra.mxu2 %vm2544_vm1, %v3820_v20  ;;  %v935_v55 = vsel %vm801_vm3, %v933_v49, %v934_v12 }
 0x210   : > { %v1405_v48 = vpop.f32.mrf.mxu3 }
 0x211   : > { %v3529_v33 = vadd.f32 %v1405_v48, %v1341_v3  ;;  %v1278_v17 = vpop.f32.mrf.mxu2  ;;  %v1441_v3 = vadd.f32 %v1440_v19, %v3446_v62  ;;  %v1707_v62 = vld [vmem:[%s3747_s5 + $0x58] sm:$0xff] }
 0x212   : > { %v1279_v51 = vadd.f32 %v1278_v17, %v3397_v46  ;;  %v942_v46 = vsel %vm858_vm2, %v940_v14, %v941_v40 }
 0x214   : > { %v1344_v63 = vadd.f32 %v1343_v0, %v1279_v51  ;;  %v1449_v0 = vpop.f32.mrf.mxu1 }
 0x215   : > { %1670 = vmatmul.f32.gmra.mxu3 %v3384_v44  ;;  %v784_v44 = vsel %vm704_vm0, %v733_v29, 0.0  ;;  %v1352_v9 = vpop.f32.mrf.mxu0  ;;  %v3822_v29 = vld [vmem:[#allocation13_spill] sm:$0xff]  ;;  %v1450_v57 = vadd.f32 %v1449_v0, %v3476_v39 }
 0x216   : > { %1540 = vmatmul.f32.gmra.mxu2 %v3821_v21  ;;  %v943_v58 = vrot.slane %v784_v44, 2  ;;  %v936_v52 = vrot.slane %v784_v44, 1  ;;  %v1704_v44 = vld [vmem:[%s3747_s5 + $0x40] sm:$0xff] }
 0x218   : > { %v1408_v61 = vpop.f32.mrf.mxu3  ;;  %v937_v20 = vsel %vm801_vm3, %v934_v12, %v936_v52 }
 0x219   : > { %v3536_v56 = vadd.f32 %v1408_v61, %v1344_v63  ;;  %v1281_v23 = vpop.f32.mrf.mxu2  ;;  %v1706_v61 = vld [vmem:[%s3747_s5 + $0x50] sm:$0xff] }
 0x21a   : > { %v1282_v18 = vadd.f32 %v1281_v23, %v3406_v37  ;;  %v944_v37 = vsel %vm858_vm2, %v941_v40, %v943_v58 }
 0x21c   : > { %v1347_v38 = vadd.f32 %v1346_v10, %v1282_v18  ;;  %v1705_v10 = vld [vmem:[%s3747_s5 + $0x48] sm:$0xff] }
 0x21d   : > { %1673 = vmatmul.f32.gmra.mxu3 %v942_v46 }
 0x21e   : > { %2053 = vmatmul.msk.f32.gmra.mxu2 %vm2544_vm1, %v732_v25 }
 0x220   : > { %v1411_v35 = vpop.f32.mrf.mxu3 }
 0x221   : > { %v3543_v42 = vadd.f32 %v1411_v35, %v1347_v38  ;;  %v1284_v2 = vpop.f32.mrf.mxu2 }
 0x222   : > { %v1285_v6 = vadd.f32 %v1284_v2, %v3412_v24  ;;  %v1703_v2 = vld [vmem:[%s3747_s5 + $0x38] sm:$0xff] }
 0x224   : > { %v1350_v26 = vadd.f32 %v1349_v32, %v1285_v6 }
 0x225   : > { %1676 = vmatmul.f32.gmra.mxu3 %v944_v37 }
 0x226   : > { %1546 = vmatmul.f32.gmra.mxu2 %v734_v15  ;;  %v1452_v15 = vpop.f32.mrf.mxu1 }
 0x227   : > { %v1453_v18 = vadd.f32 %v1452_v15, %v3485_v34  ;;  %v1567_v15 = vpop.f32.mrf.mxu0 }
 0x228   : > { %v1414_v60 = vpop.f32.mrf.mxu3 }
 0x229   : > { %v3550_v31 = vadd.f32 %v1414_v60, %v1350_v26  ;;  %v1287_v7 = vpop.f32.mrf.mxu2  ;;  %v1701_v60 = vld [vmem:[%s3747_s5 + $0x28] sm:$0xff] }
 0x22a   : > { %v1288_v24 = vadd.f32 %v1287_v7, %v3424_v36  ;;  %v1709_v36 = vld [vmem:[%s3747_s5 + $0x68] sm:$0xff] }
 0x22b   : > { %1718 = vmatpush.msrb.mxu1 %v1709_v36 }
 0x22c   : > { %v1353_v47 = vadd.f32 %v1352_v9, %v1288_v24  ;;  %v1700_v24 = vld [vmem:[%s3747_s5 + $0x20] sm:$0xff] }
 0x22d   : > { %1719 = vmatpush.msrb.mxu1 %v1708_v30 }
 0x22e   : > { %1608 = vmatmul.f32.vlgmr.msra.gmra.mxu2 %v935_v55  ;;  %v1455_v14 = vpop.f32.mrf.mxu1 }
 0x22f   : > { %1720 = vmatpush.msrb.mxu1 %v1707_v62  ;;  %v1456_v39 = vadd.f32 %v1455_v14, %v3491_v53  ;;  %v1570_v14 = vpop.f32.mrf.mxu0 }
 0x230   : > { %v1417_v4 = vpop.f32.mrf.mxu3 }
 0x231   : > { %v3558_v41 = vadd.f32 %v1417_v4, %v1353_v47  ;;  %v1502_v11 = vpop.f32.mrf.mxu2  ;;  %1721 = vmatpush.msrb.mxu1 %v1706_v61 }
 0x232   : > { %v3560_v8 = vadd.f32 %v1502_v11, %v1438_v27  ;;  %v1698_v11 = vld [vmem:[%s3747_s5 + $0x10] sm:$0xff] }
 0x233   : > { %1722 = vmatpush.msrb.mxu1 %v1705_v10 }
 0x235   : > { %1723 = vmatpush.msrb.mxu1 %v1704_v44 }
 0x236   : > { %1611 = vmatmul.f32.gmra.mxu2 %v937_v20  ;;  %v1458_v43 = vpop.f32.mrf.mxu1 }
 0x237   : > { %1724 = vmatpush.msrb.mxu1 %v1703_v2  ;;  %v1459_v34 = vadd.f32 %v1458_v43, %v3499_v28  ;;  %v1573_v43 = vpop.f32.mrf.mxu0 }
 0x239   : > { %v1505_v48 = vpop.f32.mrf.mxu2  ;;  %1725 = vmatpush.msrb.mxu1 %v1702_v1 }
 0x23a   : > { %v3567_v25 = vadd.f32 %v1505_v48, %v1441_v3  ;;  %v1697_v3 = vld [vmem:[%s3747_s5 + $0x8] sm:$0xff] }
 0x23b   : > { %1726 = vmatpush.msrb.mxu1 %v1701_v60 }
 0x23d   : > { %1727 = vmatpush.msrb.mxu1 %v1700_v24 }
 0x23e   : > { %1631 = vmatmul.f32.vlgmr.msrb.gmra.mxu2 %v3822_v29  ;;  %v1461_v38 = vpop.f32.mrf.mxu1  ;;  %v1696_v29 = vld [vmem:[%s3747_s5] sm:$0xff] }
 0x23f   : > { %v1462_v53 = vadd.f32 %v1461_v38, %v3505_v50  ;;  %1728 = vmatpush.msrb.mxu1 %v1699_v5 }
 0x241   : > { %v1508_v17 = vpop.f32.mrf.mxu2  ;;  %1729 = vmatpush.msrb.mxu1 %v1698_v11 }
 0x242   : > { %v3574_v51 = vadd.f32 %v1508_v17, %v1444_v45 }
 0x243   : > { %1730 = vmatpush.msrb.mxu1 %v1697_v3 }
 0x244   : > { %v1574_v1 = vadd.f32 %v1573_v43, %v3574_v51 }
 0x245   : > { %1731 = vmatpush.msrb.mxu1 %v1696_v29 }
 0x246   : > { %v1464_v37 = vpop.f32.mrf.mxu1 }
 0x247   : > { %v1465_v28 = vadd.f32 %v1464_v37, %v3512_v54 }
 0x249   : > { %v1511_v21 = vpop.f32.mrf.mxu2 }
 0x24a   : > { %v3580_v63 = vadd.f32 %v1511_v21, %v1447_v59 }
 0x24e   : > { %v1467_v49 = vpop.f32.mrf.mxu1 }
 0x24f   : > { %v1468_v22 = vadd.f32 %v1467_v49, %v3522_v13 }
 0x251   : > { %v1514_v40 = vpop.f32.mrf.mxu2 }
 0x252   : > { %v3586_v23 = vadd.f32 %v1514_v40, %v1450_v57 }
 0x256   : > { %v1470_v50 = vpop.f32.mrf.mxu1 }
 0x257   : > { %v1471_v54 = vadd.f32 %v1470_v50, %v3529_v33 }
 0x259   : > { %v1517_v19 = vpop.f32.mrf.mxu2 }
 0x25a   : > { %v3592_v46 = vadd.f32 %v1517_v19, %v1453_v18 }
 0x25e   : > { %v1473_v47 = vpop.f32.mrf.mxu1 }
 0x25f   : > { %v1474_v13 = vadd.f32 %v1473_v47, %v3536_v56 }
 0x261   : > { %v1520_v35 = vpop.f32.mrf.mxu2 }
 0x262   : > { %v3598_v58 = vadd.f32 %v1520_v35, %v1456_v39  ;;  %v1576_v39 = vpop.f32.mrf.mxu0 }
 0x263   : > { %v1577_v49 = vadd.f32 %v1576_v39, %v3580_v63 }
 0x266   : > { %v1476_v20 = vpop.f32.mrf.mxu1 }
 0x267   : > { %v1477_v33 = vadd.f32 %v1476_v20, %v3543_v42  ;;  %v1635_v42 = vpop.f32.mrf.mxu3 }
 0x269   : > { %v1523_v6 = vpop.f32.mrf.mxu2 }
 0x26a   : > { %v3604_v32 = vadd.f32 %v1523_v6, %v1459_v34  ;;  %v1579_v37 = vpop.f32.mrf.mxu0 }
 0x26b   : > { %v1580_v24 = vadd.f32 %v1579_v37, %v3586_v23 }
 0x26e   : > { %v1479_v30 = vpop.f32.mrf.mxu1 }
 0x26f   : > { %v1480_v56 = vadd.f32 %v1479_v30, %v3550_v31  ;;  %v1638_v10 = vpop.f32.mrf.mxu3  ;;  %v1568_v31 = vadd.f32 %v1567_v15, %v3560_v8 }
 0x271   : > { %v1526_v16 = vpop.f32.mrf.mxu2 }
 0x272   : > { %v3610_v26 = vadd.f32 %v1526_v16, %v1462_v53  ;;  %v1639_v16 = vadd.f32 %v1638_v10, %v1574_v1  ;;  %v1582_v8 = vpop.f32.mrf.mxu0 }
 0x273   : > { %v1583_v5 = vadd.f32 %v1582_v8, %v3592_v46 }
 0x276   : > { %v1482_v62 = vpop.f32.mrf.mxu1 }
 0x277   : > { %v1483_v59 = vadd.f32 %v1482_v62, %v3558_v41  ;;  %v1641_v44 = vpop.f32.mrf.mxu3  ;;  %v1571_v41 = vadd.f32 %v1570_v14, %v3567_v25 }
 0x279   : > { %v1529_v7 = vpop.f32.mrf.mxu2  ;;  %v1636_v34 = vadd.f32 %v1635_v42, %v1571_v41 }
 0x27a   : > { %v3616_v12 = vadd.f32 %v1529_v7, %v1465_v28  ;;  %v1682_v28 = vmax.f32 %v1639_v16, 0.0  ;;  %v1642_v7 = vadd.f32 %v1641_v44, %v1577_v49  ;;  %v2150_v16 = vld [vmem:[%s2362_s21] sm:$0xff] }
 0x27b   : > { %v1681_v53 = vmax.f32 %v1636_v34, 0.0 }
 0x27c   : > { %v1683_v25 = vmax.f32 %v1642_v7, 0.0 }
 0x27f   : > { %v1644_v6 = vpop.f32.mrf.mxu3 }
 0x281   : > { %v1532_v55 = vpop.f32.mrf.mxu2 }
 0x282   : > { %v3622_v9 = vadd.f32 %v1532_v55, %v1468_v22  ;;  %v1585_v22 = vpop.f32.mrf.mxu0  ;;  %v1645_v55 = vadd.f32 %v1644_v6, %v1580_v24 }
 0x283   : > { %v1586_v63 = vadd.f32 %v1585_v22, %v3598_v58 }
 0x284   : > { %v1684_v51 = vmax.f32 %v1645_v55, 0.0 }
 0x287   : > { %v1647_v60 = vpop.f32.mrf.mxu3 }
 0x288   : > { %v1648_v47 = vadd.f32 %v1647_v60, %v1583_v5 }
 0x289   : > { %v1535_v4 = vpop.f32.mrf.mxu2 }
 0x28a   : > { %v3628_v27 = vadd.f32 %v1535_v4, %v1471_v54  ;;  %v1588_v4 = vpop.f32.mrf.mxu0  ;;  %v1685_v11 = vmax.f32 %v1648_v47, 0.0 }
 0x28b   : > { %v1589_v23 = vadd.f32 %v1588_v4, %v3604_v32 }
 0x28f   : > { %v1650_v50 = vpop.f32.mrf.mxu3 }
 0x291   : > { %v1538_v52 = vpop.f32.mrf.mxu2 }
 0x292   : > { %v3634_v36 = vadd.f32 %v1538_v52, %v1474_v13  ;;  %v1651_v13 = vadd.f32 %v1650_v50, %v1586_v63  ;;  %v1591_v20 = vpop.f32.mrf.mxu0  ;;  %v2152_v50 = vld [vmem:[%s2362_s21 + $0x10] sm:$0xff] }
 0x293   : > { %v1592_v46 = vadd.f32 %v1591_v20, %v3610_v26 }
 0x294   : > { %v1686_v3 = vmax.f32 %v1651_v13, 0.0  ;;  %v2154_v13 = vld [vmem:[%s2362_s21 + $0x20] sm:$0xff] }
 0x297   : > { %v1653_v54 = vpop.f32.mrf.mxu3 }
 0x299   : > { %v1541_v0 = vpop.f32.mrf.mxu2 }
 0x29a   : > { %v3640_v48 = vadd.f32 %v1541_v0, %v1477_v33  ;;  %v1654_v33 = vadd.f32 %v1653_v54, %v1589_v23  ;;  %v1594_v29 = vpop.f32.mrf.mxu0  ;;  %v2153_v54 = vld [vmem:[%s2362_s21 + $0x18] sm:$0xff] }
 0x29c   : > { %v1687_v30 = vmax.f32 %v1654_v33, 0.0  ;;  %v2155_v33 = vld [vmem:[%s2362_s21 + $0x28] sm:$0xff] }
 0x29f   : > { %v1656_v52 = vpop.f32.mrf.mxu3 }
 0x2a1   : > { %v1544_v45 = vpop.f32.mrf.mxu2 }
 0x2a2   : > { %v1545_v17 = vadd.f32 %v1544_v45, %v1480_v56  ;;  %v1657_v56 = vadd.f32 %v1656_v52, %v1592_v46  ;;  %v1595_v45 = vadd.f32 %v1594_v29, %v3616_v12  ;;  %v1597_v15 = vpop.f32.mrf.mxu0 }
 0x2a4   : > { %v1688_v58 = vmax.f32 %v1657_v56, 0.0  ;;  %v2156_v56 = vld [vmem:[%s2362_s21 + $0x30] sm:$0xff] }
 0x2a7   : > { %v1659_v0 = vpop.f32.mrf.mxu3 }
 0x2a8   : > { %v1660_v62 = vadd.f32 %v1659_v0, %v1595_v45 }
 0x2a9   : > { %v1547_v21 = vpop.f32.mrf.mxu2 }
 0x2aa   : > { %v1548_v61 = vadd.f32 %v1547_v21, %v1483_v59  ;;  %v1598_v59 = vadd.f32 %v1597_v15, %v3622_v9  ;;  %v1689_v32 = vmax.f32 %v1660_v62, 0.0  ;;  %v1600_v42 = vpop.f32.mrf.mxu0  ;;  %v2157_v62 = vld [vmem:[%s2362_s21 + $0x38] sm:$0xff] }
 0x2ab   : > { %v1601_v26 = vadd.f32 %v1600_v42, %v3628_v27  ;;  %v2158_v42 = vld [vmem:[%s2362_s21 + $0x40] sm:$0xff] }
 0x2b1   : > { %v1609_v57 = vpop.f32.mrf.mxu2 }
 0x2b2   : > { %v3647_v40 = vadd.f32 %v1609_v57, %v1545_v17  ;;  %v1662_v17 = vpop.f32.mrf.mxu3  ;;  %v1603_v10 = vpop.f32.mrf.mxu0 }
 0x2b3   : > { %v1604_v12 = vadd.f32 %v1603_v10, %v3634_v36 }
 0x2b9   : > { %v1612_v18 = vpop.f32.mrf.mxu2 }
 0x2ba   : > { %v3649_v19 = vadd.f32 %v1612_v18, %v1548_v61  ;;  %v1665_v21 = vpop.f32.mrf.mxu3  ;;  %v1663_v61 = vadd.f32 %v1662_v17, %v1598_v59 }
 0x2bb   : > { %v1666_v57 = vadd.f32 %v1665_v21, %v1601_v26 }
 0x2bc   : > { %v1690_v14 = vmax.f32 %v1663_v61, 0.0 }
 0x2bd   : > { %v1691_v18 = vmax.f32 %v1666_v57, 0.0 }
 0x2c1   : > { %v1632_v38 = vpop.f32.mrf.mxu2 }
 0x2c2   : > { %v1633_v35 = vadd.f32 %v1632_v38, %v1568_v31  ;;  %v1668_v43 = vpop.f32.mrf.mxu3  ;;  %v1606_v31 = vpop.f32.mrf.mxu0 }
 0x2c3   : > { %v1669_v44 = vadd.f32 %v1668_v43, %v1604_v12  ;;  %v1607_v9 = vadd.f32 %v1606_v31, %v3640_v48  ;;  %v3670_v48 = vld [vmem:[%s3750_s8] ss:$0 sm:$0xff]  ;;  %v2159_v43 = vld [vmem:[%s2362_s21 + $0x48] sm:$0xff] }
 0x2c4   : > { %v1680_v2 = vmax.f32 %v1633_v35, 0.0 }
 0x2c5   : > { %v1692_v38 = vmax.f32 %v1669_v44, 0.0 }
 0x2c6   : > { %1732 = vmatmul.f32.vlgmr.msrb.gmra.mxu1 %v1680_v2 }
 0x2ca   : > { %v1671_v39 = vpop.f32.mrf.mxu3 }
 0x2cb   : > { %v1672_v35 = vadd.f32 %v1671_v39, %v1607_v9  ;;  %v2160_v39 = vld [vmem:[%s2362_s21 + $0x50] sm:$0xff] }
 0x2cd   : > { %v1693_v27 = vmax.f32 %v1672_v35, 0.0 }
 0x2ce   : > { %1735 = vmatmul.f32.gmra.mxu1 %v1681_v53 }
 0x2d2   : > { %v1674_v41 = vpop.f32.mrf.mxu3 }
 0x2d3   : > { %v1675_v2 = vadd.f32 %v1674_v41, %v3647_v40  ;;  %v2161_v41 = vld [vmem:[%s2362_s21 + $0x58] sm:$0xff] }
 0x2d5   : > { %v1694_v34 = vmax.f32 %v1675_v2, 0.0 }
 0x2d6   : > { %1738 = vmatmul.f32.gmra.mxu1 %v1682_v28  ;;  %v2151_v28 = vld [vmem:[%s2362_s21 + $0x8] sm:$0xff] }
 0x2da   : > { %v1677_v36 = vpop.f32.mrf.mxu3 }
 0x2db   : > { %v1678_v6 = vadd.f32 %v1677_v36, %v3649_v19 }
 0x2dd   : > { %v1695_v37 = vmax.f32 %v1678_v6, 0.0 }
 0x2de   : > { %1741 = vmatmul.f32.gmra.mxu1 %v1683_v25 }
 0x2e6   : > { %1744 = vmatmul.f32.gmra.mxu1 %v1684_v51 }
 0x2ee   : > { %1747 = vmatmul.f32.gmra.mxu1 %v1685_v11 }
 0x2f6   : > { %1750 = vmatmul.f32.gmra.mxu1 %v1686_v3 }
 0x2fe   : > { %1753 = vmatmul.f32.gmra.mxu1 %v1687_v30 }
 0x306   : > { %1756 = vmatmul.f32.gmra.mxu1 %v1688_v58 }
 0x30e   : > { %1759 = vmatmul.f32.gmra.mxu1 %v1689_v32 }
 0x316   : > { %1762 = vmatmul.f32.gmra.mxu1 %v1690_v14 }
 0x31e   : > { %1765 = vmatmul.f32.gmra.mxu1 %v1691_v18 }
 0x326   : > { %1768 = vmatmul.f32.gmra.mxu1 %v1692_v38 }
 0x32e   : > { %1771 = vmatmul.f32.gmra.mxu1 %v1693_v27 }
 0x336   : > { %1774 = vmatmul.f32.gmra.mxu1 %v1694_v34 }
 0x33e   : > { %1777 = vmatmul.f32.gmra.mxu1 %v1695_v37  ;;  %v2162_v37 = vld [vmem:[%s2362_s21 + $0x60] sm:$0xff] }
 0x343   : > { %v1733_v1 = vpop.f32.mrf.mxu1 }
 0x344   : > { %v1734_v53 = vadd.f32 %v3670_v48, %v1733_v1 }
 0x346   : > { %v1781_v60 = vadd.f32 %v2150_v16, %v1734_v53 }
 0x348   : > { %v1797_v40 = vmax.f32 %v1781_v60, 0.0 }
 0x34a   : > { %1813 = vst [vmem:[%s3679_s17] sm:$0xff] %v1797_v40  ;;  %v2163_v40 = vld [vmem:[%s2362_s21 + $0x68] sm:$0xff] }
 0x34b   : > { %v1736_v19 = vpop.f32.mrf.mxu1 }
 0x34c   : > { %v1737_v49 = vadd.f32 %v3670_v48, %v1736_v19 }
 0x34e   : > { %v1782_v8 = vadd.f32 %v2151_v28, %v1737_v49 }
 0x350   : > { %v1798_v7 = vmax.f32 %v1782_v8, 0.0 }
 0x352   : > { %1814 = vst [vmem:[%s3679_s17 + $0x8] sm:$0xff] %v1798_v7  ;;  %v2164_v7 = vld [vmem:[%s2362_s21 + $0x70] sm:$0xff] }
 0x353   : > { %v1739_v24 = vpop.f32.mrf.mxu1 }
 0x354   : > { %v1740_v25 = vadd.f32 %v3670_v48, %v1739_v24 }
 0x356   : > { %v1783_v22 = vadd.f32 %v2152_v50, %v1740_v25 }
 0x358   : > { %v1799_v55 = vmax.f32 %v1783_v22, 0.0 }
 0x35a   : > { %1815 = vst [vmem:[%s3679_s17 + $0x10] sm:$0xff] %v1799_v55  ;;  %v2165_v55 = vld [vmem:[%s2362_s21 + $0x78] sm:$0xff] }
 0x35b   : > { %v1742_v5 = vpop.f32.mrf.mxu1 }
 0x35c   : > { %v1743_v51 = vadd.f32 %v3670_v48, %v1742_v5 }
 0x35e   : > { %v1784_v47 = vadd.f32 %v2153_v54, %v1743_v51 }
 0x360   : > { %v1800_v4 = vmax.f32 %v1784_v47, 0.0 }
 0x362   : > { %1816 = vst [vmem:[%s3679_s17 + $0x18] sm:$0xff] %v1800_v4 }
 0x363   : > { %v1745_v63 = vpop.f32.mrf.mxu1 }
 0x364   : > { %v1746_v11 = vadd.f32 %v3670_v48, %v1745_v63 }
 0x366   : > { %v1785_v52 = vadd.f32 %v2154_v13, %v1746_v11 }
 0x368   : > { %v1801_v20 = vmax.f32 %v1785_v52, 0.0 }
 0x36a   : > { %1817 = vst [vmem:[%s3679_s17 + $0x20] sm:$0xff] %v1801_v20 }
 0x36b   : > { %v1748_v23 = vpop.f32.mrf.mxu1 }
 0x36c   : > { %v1749_v3 = vadd.f32 %v3670_v48, %v1748_v23 }
 0x36e   : > { %v1786_v0 = vadd.f32 %v2155_v33, %v1749_v3 }
 0x370   : > { %v1802_v46 = vmax.f32 %v1786_v0, 0.0 }
 0x372   : > { %1818 = vst [vmem:[%s3679_s17 + $0x28] sm:$0xff] %v1802_v46 }
 0x373   : > { %v1751_v30 = vpop.f32.mrf.mxu1 }
 0x374   : > { %v1752_v29 = vadd.f32 %v3670_v48, %v1751_v30 }
 0x376   : > { %v1787_v45 = vadd.f32 %v2156_v56, %v1752_v29 }
 0x378   : > { %v1803_v58 = vmax.f32 %v1787_v45, 0.0 }
 0x37a   : > { %1819 = vst [vmem:[%s3679_s17 + $0x30] sm:$0xff] %v1803_v58 }
 0x37b   : > { %v1754_v17 = vpop.f32.mrf.mxu1 }
 0x37c   : > { %v1755_v15 = vadd.f32 %v3670_v48, %v1754_v17 }
 0x37e   : > { %v1788_v59 = vadd.f32 %v2157_v62, %v1755_v15 }
 0x380   : > { %v1804_v32 = vmax.f32 %v1788_v59, 0.0 }
 0x382   : > { %1820 = vst [vmem:[%s3679_s17 + $0x38] sm:$0xff] %v1804_v32 }
 0x383   : > { %v1757_v21 = vpop.f32.mrf.mxu1 }
 0x384   : > { %v1758_v61 = vadd.f32 %v3670_v48, %v1757_v21 }
 0x386   : > { %v1789_v26 = vadd.f32 %v2158_v42, %v1758_v61 }
 0x388   : > { %v1805_v14 = vmax.f32 %v1789_v26, 0.0 }
 0x38a   : > { %1821 = vst [vmem:[%s3679_s17 + $0x40] sm:$0xff] %v1805_v14 }
 0x38b   : > { %v1760_v57 = vpop.f32.mrf.mxu1 }
 0x38c   : > { %v1761_v10 = vadd.f32 %v3670_v48, %v1760_v57 }
 0x38e   : > { %v1790_v12 = vadd.f32 %v2159_v43, %v1761_v10 }
 0x390   : > { %v1806_v18 = vmax.f32 %v1790_v12, 0.0 }
 0x392   : > { %1822 = vst [vmem:[%s3679_s17 + $0x48] sm:$0xff] %v1806_v18 }
 0x393   : > { %v1763_v44 = vpop.f32.mrf.mxu1 }
 0x394   : > { %v1764_v31 = vadd.f32 %v3670_v48, %v1763_v44 }
 0x396   : > { %v1791_v9 = vadd.f32 %v2160_v39, %v1764_v31 }
 0x398   : > { %v1807_v38 = vmax.f32 %v1791_v9, 0.0 }
 0x39a   : > { %1823 = vst [vmem:[%s3679_s17 + $0x50] sm:$0xff] %v1807_v38 }
 0x39b   : > { %v1766_v35 = vpop.f32.mrf.mxu1 }
 0x39c   : > { %v1767_v27 = vadd.f32 %v3670_v48, %v1766_v35 }
 0x39e   : > { %v1792_v2 = vadd.f32 %v2161_v41, %v1767_v27 }
 0x3a0   : > { %v1808_v34 = vmax.f32 %v1792_v2, 0.0 }
 0x3a2   : > { %1824 = vst [vmem:[%s3679_s17 + $0x58] sm:$0xff] %v1808_v34 }
 0x3a3   : > { %v1769_v36 = vpop.f32.mrf.mxu1 }
 0x3a4   : > { %v1770_v6 = vadd.f32 %v3670_v48, %v1769_v36 }
 0x3a6   : > { %v1793_v1 = vadd.f32 %v2162_v37, %v1770_v6 }
 0x3a8   : > { %v1809_v53 = vmax.f32 %v1793_v1, 0.0 }
 0x3aa   : > { %1825 = vst [vmem:[%s3679_s17 + $0x60] sm:$0xff] %v1809_v53 }
 0x3ab   : > { %v1772_v16 = vpop.f32.mrf.mxu1 }
 0x3ac   : > { %v1773_v60 = vadd.f32 %v3670_v48, %v1772_v16 }
 0x3ae   : > { %v1794_v19 = vadd.f32 %v2163_v40, %v1773_v60 }
 0x3b0   : > { %v1810_v49 = vmax.f32 %v1794_v19, 0.0 }
 0x3b2   : > { %1826 = vst [vmem:[%s3679_s17 + $0x68] sm:$0xff] %v1810_v49 }
 0x3b3   : > { %v1775_v28 = vpop.f32.mrf.mxu1 }
 0x3b4   : > { %v1776_v8 = vadd.f32 %v3670_v48, %v1775_v28 }
 0x3b6   : > { %v1795_v24 = vadd.f32 %v2164_v7, %v1776_v8 }
 0x3b8   : > { %v1811_v25 = vmax.f32 %v1795_v24, 0.0 }
 0x3ba   : > { %1827 = vst [vmem:[%s3679_s17 + $0x70] sm:$0xff] %v1811_v25 }
 0x3bb   : > { %v1778_v50 = vpop.f32.mrf.mxu1 }
 0x3bc   : > { %v1779_v22 = vadd.f32 %v3670_v48, %v1778_v50 }
 0x3be   : > { %v1796_v5 = vadd.f32 %v2165_v55, %v1779_v22 }
 0x3c0   : > { %v1812_v51 = vmax.f32 %v1796_v5, 0.0 }
 0x3c2   : > { %1828 = vst [vmem:[%s3679_s17 + $0x78] sm:$0xff] %v1812_v51 }
 0x3c3 PF: > { %s19_s13 = sadd.s32 1, %s2204_s13   ;;  %s3823_s30 = smov %s2196_s11 }
 0x3c4   : > { %p16_p12 = scmp.ge.s32.totalorder %s19_s13, 6   ;;  %s3824_s10 = smov %s2200_s12 }
 0x3c5   : > { %s3825_s11 = smov %s3828_s14  ;;  %s3826_s12 = smov %s3832_s15 }
 0x3c6   :  { %18 = sbr.rel (!%p16_p12) target bundleno = 3 (0x3), region = 92 }

</bundles_post_ra>
